<compile_context>
chip_gen: v7x
topology: tpu7x:2x2x1
jax: 0.10.0
libtpu: 0.0.40
codegen_flags: <defaults>
</compile_context>

<pallas_src>
import functools

import jax
import jax.numpy as jnp
from jax.experimental import pallas as pl
from jax.experimental.pallas import tpu as pltpu

EPS = 1e-5  # nn.LayerNorm default eps


def _layernorm(x, gamma, beta):
    mu = jnp.mean(x, axis=-1, keepdims=True)
    var = jnp.mean((x - mu) ** 2, axis=-1, keepdims=True)
    return (x - mu) * jax.lax.rsqrt(var + EPS) * gamma + beta


def _split_heads(t, heads, dim_head):
    """(N, heads*dim_head) -> (heads, N, dim_head) via static lane slices."""
    return jnp.concatenate(
        [t[None, :, h * dim_head:(h + 1) * dim_head] for h in range(heads)], axis=0)


# ---------------------------------------------------------------------------
# Fused kernel: one (batch-block b, layer l) grid step
# ---------------------------------------------------------------------------
def _fused_transformer_kernel(sph_ref, x_ref, g_ref, b_ref,
                              w_qkv_ref, w_out_ref, bo_ref,
                              fg_ref, fb_ref, o_ref, acc_ref,
                              *, heads, dim_head, q_tile):
    layer = pl.program_id(1)
    depth = pl.num_programs(1)

    # Initialize the resident residual stream at the first layer of this block.
    @pl.when(layer == 0)
    def _init():
        acc_ref[...] = x_ref[...]

    bt, n, d_model = acc_ref.shape
    inner = heads * dim_head
    n_tiles = n // q_tile

    x = acc_ref[...]                                     # (Bt, N, D) f32 residual stream

    # ---- pre-attention LayerNorm (f32) over all Bt*N rows -----------------
    xn = _layernorm(x.reshape(bt * n, d_model), g_ref[0], b_ref[0])

    # ---- fused QKV projection: one wide matmul (scale folded into W_q) ----
    qkv = jnp.dot(xn.astype(jnp.bfloat16), w_qkv_ref[0],
                  preferred_element_type=jnp.float32)    # (Bt*N, 3*inner) f32 acc
    qkv = qkv.astype(jnp.bfloat16)                       # cast once; no f32 q/k/v live

    for b in range(bt):                                  # static batch loop
        blk = qkv[b * n:(b + 1) * n]                     # (N, 3*inner)
        q_all = _split_heads(blk[:, 0 * inner:1 * inner], heads, dim_head)  # (H,N,dh)
        k_all = _split_heads(blk[:, 1 * inner:2 * inner], heads, dim_head)
        v_all = _split_heads(blk[:, 2 * inner:3 * inner], heads, dim_head)

        for t in range(n_tiles):                         # static query-row tiling
            r0 = t * q_tile
            q_t = q_all[:, r0:r0 + q_tile, :]            # (H, Tq, dh) bf16

            # all-head logits in one batched matmul (k.T folded into dot dims)
            dots = jnp.einsum('hqc,hkc->hqk', q_t, k_all,
                              preferred_element_type=jnp.float32)   # (H, Tq, N)
            # NOTE: any positive factor shared across heads (the 1/sqrt(dh) scale
            # and 1+sph when > 0) cancels under the cross-head normalization; the
            # sph multiply is kept to preserve exact module semantics.
            dots = dots * sph_ref[r0:r0 + q_tile, :][None]

            # cross-head normalization (torch.mean / unbiased torch.std, dim=heads)
            # NOTE: heads == 1 divides by zero, exactly matching torch.std(dim=1).
            mean_h = jnp.mean(dots, axis=0, keepdims=True)
            cent = dots - mean_h                          # reused for var and logits
            var_h = jnp.sum(cent * cent, axis=0, keepdims=True) * (1.0 / (heads - 1))
            logits = cent * jax.lax.rsqrt(var_h)

            # softmax over keys (exp/reciprocal ride the EUP slot)
            m = jnp.max(logits, axis=-1, keepdims=True)
            e = jnp.exp(logits - m)
            p = (e * pl.reciprocal(jnp.sum(e, axis=-1, keepdims=True),
                                   approx=True)).astype(jnp.bfloat16)

            # attention output, all heads batched
            out_h = jnp.einsum('hqk,hkc->hqc', p, v_all,
                               preferred_element_type=jnp.float32)  # (H, Tq, dh)
            # re-pack heads into the lane axis -> ONE (Tq, inner)@(inner, D) matmul
            out_cat = jnp.concatenate([out_h[h] for h in range(heads)],
                                      axis=-1).astype(jnp.bfloat16)  # (Tq, inner)
            y = jnp.dot(out_cat, w_out_ref[0],
                        preferred_element_type=jnp.float32) + bo_ref[0]  # (Tq, D)

            # residual update, kept resident in VMEM
            acc_ref[b, r0:r0 + q_tile, :] = x[b, r0:r0 + q_tile, :] + y
    # TODO(synk): nn.Dropout with p=0.0 is identity (eval); training-mode dropout
    # is not implemented.

    # ---- final LayerNorm fused into the last layer; single HBM write ------
    @pl.when(layer == depth - 1)
    def _finalize():
        o_ref[...] = _layernorm(acc_ref[...], fg_ref[...], fb_ref[...])


# ---------------------------------------------------------------------------
# Wrapper
# ---------------------------------------------------------------------------
def _pick_q_tile(n, target=256):
    if n <= target:
        return n
    for t in range(target, 0, -1):
        if n % t == 0:
            return t
    return n


def _pick_batch_block(batch, n, target_rows=256):
    want = max(1, target_rows // max(n, 1))
    bt = 1
    for cand in range(1, batch + 1):
        if batch % cand == 0 and cand <= want:
            bt = cand
    return bt


def _pick_vmem_limit():
    # Generation-aware scoped-VMEM limit: ~100 MiB on v5e/v6e (128 MiB physical),
    # ~54 MiB on v7x (64 MiB physical), with headroom for double-buffered weights.
    try:
        cap = pltpu.get_tpu_info().vmem_capacity_bytes
        return min(int(cap * 0.85), 100 * 1024 * 1024)
    except Exception:
        return 48 * 1024 * 1024


def transformer_forward(x, sph_dist, kparams, *, heads, dim_head):
    B, N, D = x.shape
    depth = kparams["w_qkv"].shape[0]
    inner = heads * dim_head
    sph_w = (1.0 + sph_dist).astype(jnp.float32)   # precompute once in the wrapper

    bt = _pick_batch_block(B, N)
    q_tile = _pick_q_tile(N)

    flops = 2 * B * depth * (N * D * 3 * inner            # QKV projection
                             + 2 * heads * N * N * dim_head  # QK^T and PV
                             + N * inner * D)              # output projection
    transcendentals = B * depth * heads * N * N
    bytes_accessed = (2 * B * N * D * 4                    # x read + out write
                      + (B // bt) * N * N * 4              # sph per batch block
                      + (B // bt) * depth * (D * 3 * inner + inner * D) * 2  # bf16 W
                      + (B // bt) * depth * 3 * D * 4)     # LN params + bias

    kernel = functools.partial(_fused_transformer_kernel,
                               heads=heads, dim_head=dim_head, q_tile=q_tile)
    return pl.pallas_call(
        kernel,
        out_shape=jax.ShapeDtypeStruct((B, N, D), jnp.float32),
        grid=(B // bt, depth),
        in_specs=[
            pl.BlockSpec((N, N), lambda b, l: (0, 0)),                     # 1+sph
            pl.BlockSpec((bt, N, D), lambda b, l: (b, 0, 0)),              # x
            pl.BlockSpec((1, 1, D), lambda b, l: (l, 0, 0)),               # ln gamma
            pl.BlockSpec((1, 1, D), lambda b, l: (l, 0, 0)),               # ln beta
            pl.BlockSpec((1, D, 3 * inner), lambda b, l: (l, 0, 0)),       # W_qkv
            pl.BlockSpec((1, inner, D), lambda b, l: (l, 0, 0)),           # W_out
            pl.BlockSpec((1, 1, D), lambda b, l: (l, 0, 0)),               # b_out
            pl.BlockSpec((1, D), lambda b, l: (0, 0)),                     # final gamma
            pl.BlockSpec((1, D), lambda b, l: (0, 0)),                     # final beta
        ],
        out_specs=pl.BlockSpec((bt, N, D), lambda b, l: (b, 0, 0)),
        scratch_shapes=[pltpu.VMEM((bt, N, D), jnp.float32)],   # resident residual
        compiler_params=pltpu.CompilerParams(
            dimension_semantics=("parallel", "arbitrary"),
            vmem_limit_bytes=_pick_vmem_limit()),
        cost_estimate=pl.CostEstimate(flops=flops,
                                      transcendentals=transcendentals,
                                      bytes_accessed=bytes_accessed),
    )(sph_w, x,
      kparams["ln_gamma"], kparams["ln_beta"],
      kparams["w_qkv"], kparams["w_out"], kparams["b_out"],
      kparams["final_gamma"], kparams["final_beta"])


# ---------------------------------------------------------------------------
# Parameters (canonical f32 layout) + packing into the kernel layout
# ---------------------------------------------------------------------------
def init_params(key, *, dim, depth, heads, dim_head):
    inner = heads * dim_head
    k1, k2, k3 = jax.random.split(key, 3)
    return dict(
        ln_gamma=jnp.ones((depth, 1, dim), jnp.float32),
        ln_beta=jnp.zeros((depth, 1, dim), jnp.float32),
        w_qkv=jax.random.normal(k1, (depth, dim, 3 * inner), jnp.float32) * 0.05,
        w_out=jax.random.normal(k2, (depth, inner, dim), jnp.float32) * 0.05,
        b_out=jax.random.normal(k3, (depth, 1, dim), jnp.float32) * 0.05,
        final_gamma=jnp.ones((1, dim), jnp.float32),
        final_beta=jnp.zeros((1, dim), jnp.float32),
    )


def pack_params(params, *, heads, dim_head):
    inner = heads * dim_head
    scale = dim_head ** -0.5
    w = params["w_qkv"]
    # Fold the 1/sqrt(dim_head) scale into W_q at pack time (zero runtime cost).
    w_qkv = jnp.concatenate([w[..., :inner] * scale, w[..., inner:]], axis=-1)
    return dict(
        ln_gamma=params["ln_gamma"], ln_beta=params["ln_beta"],
        w_qkv=w_qkv.astype(jnp.bfloat16),
        w_out=params["w_out"].astype(jnp.bfloat16),
        b_out=params["b_out"],
        final_gamma=params["final_gamma"], final_beta=params["final_beta"],
    )


# ---------------------------------------------------------------------------
# Pure-JAX f32 reference (mirrors the PyTorch semantics) for validation
# ---------------------------------------------------------------------------
def _ref_layernorm(x, gamma, beta):
    mu = jnp.mean(x, axis=-1, keepdims=True)
    var = jnp.mean((x - mu) ** 2, axis=-1, keepdims=True)
    return (x - mu) / jnp.sqrt(var + EPS) * gamma + beta


def ref_transformer(x, sph, params, heads, dim_head):
    B, N, D = x.shape
    inner = heads * dim_head
    scale = dim_head ** -0.5
    depth = params["w_qkv"].shape[0]
    for l in range(depth):
        xn = _ref_layernorm(x, params["ln_gamma"][l], params["ln_beta"][l])
        qkv = xn @ params["w_qkv"][l]
        q, k, v = jnp.split(qkv, 3, axis=-1)
        to_heads = lambda t: t.reshape(B, N, heads, dim_head).transpose(0, 2, 1, 3)
        q, k, v = map(to_heads, (q, k, v))
        dots = jnp.einsum("bhnd,bhmd->bhnm", q, k) * scale
        dots = dots * (1.0 + sph)[None, None]
        mean = jnp.mean(dots, axis=1, keepdims=True)
        std = jnp.sqrt(jnp.sum((dots - mean) ** 2, axis=1, keepdims=True) / (heads - 1))
        attn = jax.nn.softmax((dots - mean) / std, axis=-1)
        out = jnp.einsum("bhnm,bhmd->bhnd", attn, v)
        out = out.transpose(0, 2, 1, 3).reshape(B, N, inner)
        x = out @ params["w_out"][l] + params["b_out"][l] + x
    return _ref_layernorm(x, params["final_gamma"], params["final_beta"])


# ---------------------------------------------------------------------------
if __name__ == "__main__":
    B, N, DIM = 2, 8, 32
    HEADS, DIM_HEAD, DEPTH = 4, 8, 2

    root = jax.random.PRNGKey(0)
    k_x, k_s, k_p = jax.random.split(root, 3)

    x = jax.random.normal(k_x, (B, N, DIM), jnp.float32)
    sph_dist = jax.random.uniform(k_s, (N, N), jnp.float32)

    params = init_params(k_p, dim=DIM, depth=DEPTH, heads=HEADS, dim_head=DIM_HEAD)
    kparams = pack_params(params, heads=HEADS, dim_head=DIM_HEAD)

    out = transformer_forward(x, sph_dist, kparams, heads=HEADS, dim_head=DIM_HEAD)
    out = jax.block_until_ready(out)

    ref = ref_transformer(x, sph_dist, params, HEADS, DIM_HEAD)
    assert out.shape == (B, N, DIM)
    # Kernel uses bf16 matmul operands (f32 accumulation) and an approx softmax
    # reciprocal; reference is pure f32.
    assert jnp.allclose(out, ref, rtol=2e-2, atol=2e-2), "mismatch vs reference"

    print("KERNEL_OK")
</pallas_src>

<mosaic_0001>
module attributes {stable_mosaic.version = 11 : i64} {
  func.func @_fused_transformer_kernel(%arg0: i32, %arg1: i32, %arg2: memref<8x8xf32, #tpu.memory_space<vmem>>, %arg3: memref<2x8x32xf32, #tpu.memory_space<vmem>>, %arg4: memref<1x1x32xf32, #tpu.memory_space<vmem>>, %arg5: memref<1x1x32xf32, #tpu.memory_space<vmem>>, %arg6: memref<1x32x96xbf16, #tpu.memory_space<vmem>>, %arg7: memref<1x32x32xbf16, #tpu.memory_space<vmem>>, %arg8: memref<1x1x32xf32, #tpu.memory_space<vmem>>, %arg9: memref<1x32xf32, #tpu.memory_space<vmem>>, %arg10: memref<1x32xf32, #tpu.memory_space<vmem>>, %arg11: memref<2x8x32xf32, #tpu.memory_space<vmem>>, %arg12: memref<2x8x32xf32, #tpu.memory_space<vmem>>) attributes {dimension_semantics = [#tpu.dimension_semantics<parallel>, #tpu.dimension_semantics<arbitrary>], iteration_bounds = array<i64: 1, 2>, scalar_prefetch = 0 : i64, scratch_operands = 1 : i64, tpu.core_type = #tpu.core_type<tc>, window_params = [{pipeline_mode = #tpu.pipeline_mode<synchronous>, transform_indices = @transform_0, window_bounds = array<i64: 8, 8>}, {transform_indices = @transform_1, window_bounds = array<i64: 2, 8, 32>}, {transform_indices = @transform_2, window_bounds = array<i64: 1, 1, 32>}, {transform_indices = @transform_3, window_bounds = array<i64: 1, 1, 32>}, {transform_indices = @transform_4, window_bounds = array<i64: 1, 32, 96>}, {transform_indices = @transform_5, window_bounds = array<i64: 1, 32, 32>}, {transform_indices = @transform_6, window_bounds = array<i64: 1, 1, 32>}, {pipeline_mode = #tpu.pipeline_mode<synchronous>, transform_indices = @transform_7, window_bounds = array<i64: 1, 32>}, {pipeline_mode = #tpu.pipeline_mode<synchronous>, transform_indices = @transform_8, window_bounds = array<i64: 1, 32>}, {transform_indices = @transform_9, window_bounds = array<i64: 2, 8, 32>}]} {
    %c0_i32 = arith.constant 0 : i32
    %0 = arith.cmpi eq, %arg1, %c0_i32 : i32
    %1 = arith.extui %0 : i1 to i32
    %c0_i32_0 = arith.constant 0 : i32
    %2 = arith.cmpi ne, %1, %c0_i32_0 : i32
    scf.if %2 {
      %c0_57 = arith.constant 0 : index
      %c0_58 = arith.constant 0 : index
      %c0_59 = arith.constant 0 : index
      %209 = vector.load %arg3[%c0_57, %c0_58, %c0_59] : memref<2x8x32xf32, #tpu.memory_space<vmem>>, vector<2x8x32xf32>
      %c0_60 = arith.constant 0 : index
      %c0_61 = arith.constant 0 : index
      %c0_62 = arith.constant 0 : index
      %210 = vector.load %arg12[%c0_60, %c0_61, %c0_62] : memref<2x8x32xf32, #tpu.memory_space<vmem>>, vector<2x8x32xf32>
      tpu.vector_store %arg12[%c0_60, %c0_61, %c0_62], %209 {strides = array<i32>} : memref<2x8x32xf32, #tpu.memory_space<vmem>>, vector<2x8x32xf32>,
    } else {
    }
    %c0 = arith.constant 0 : index
    %c0_1 = arith.constant 0 : index
    %c0_2 = arith.constant 0 : index
    %3 = vector.load %arg12[%c0, %c0_1, %c0_2] : memref<2x8x32xf32, #tpu.memory_space<vmem>>, vector<2x8x32xf32>
    %4 = vector.shape_cast %3 : vector<2x8x32xf32> to vector<16x32xf32>
    %c0_3 = arith.constant 0 : index
    %c0_4 = arith.constant 0 : index
    %c0_5 = arith.constant 0 : index
    %5 = vector.load %arg4[%c0_3, %c0_4, %c0_5] : memref<1x1x32xf32, #tpu.memory_space<vmem>>, vector<1x1x32xf32>
    %6 = vector.shape_cast %5 : vector<1x1x32xf32> to vector<1x32xf32>
    %c0_6 = arith.constant 0 : index
    %c0_7 = arith.constant 0 : index
    %c0_8 = arith.constant 0 : index
    %7 = vector.load %arg5[%c0_6, %c0_7, %c0_8] : memref<1x1x32xf32, #tpu.memory_space<vmem>>, vector<1x1x32xf32>
    %8 = vector.shape_cast %7 : vector<1x1x32xf32> to vector<1x32xf32>
    %cst = arith.constant dense<0.000000e+00> : vector<16xf32>
    %9 = vector.multi_reduction <add>, %4, %cst [1] : vector<16x32xf32> to vector<16xf32>
    %10 = vector.shape_cast %9 : vector<16xf32> to vector<16x1xf32>
    %cst_9 = arith.constant 3.200000e+01 : f32
    %11 = vector.broadcast %cst_9 : f32 to vector<16x1xf32>
    %12 = arith.divf %10, %11 : vector<16x1xf32>
    %13 = vector.broadcast %12 : vector<16x1xf32> to vector<16x32xf32>
    %14 = arith.subf %4, %13 : vector<16x32xf32>
    %15 = arith.mulf %14, %14 : vector<16x32xf32>
    %cst_10 = arith.constant dense<0.000000e+00> : vector<16xf32>
    %16 = vector.multi_reduction <add>, %15, %cst_10 [1] : vector<16x32xf32> to vector<16xf32>
    %17 = vector.shape_cast %16 : vector<16xf32> to vector<16x1xf32>
    %cst_11 = arith.constant 3.200000e+01 : f32
    %18 = vector.broadcast %cst_11 : f32 to vector<16x1xf32>
    %19 = arith.divf %17, %18 : vector<16x1xf32>
    %20 = vector.broadcast %12 : vector<16x1xf32> to vector<16x32xf32>
    %21 = arith.subf %4, %20 : vector<16x32xf32>
    %cst_12 = arith.constant 9.99999974E-6 : f32
    %22 = vector.broadcast %cst_12 : f32 to vector<16x1xf32>
    %23 = arith.addf %19, %22 : vector<16x1xf32>
    %24 = math.rsqrt %23 : vector<16x1xf32>
    %25 = vector.broadcast %24 : vector<16x1xf32> to vector<16x32xf32>
    %26 = arith.mulf %21, %25 : vector<16x32xf32>
    %27 = vector.broadcast %6 : vector<1x32xf32> to vector<16x32xf32>
    %28 = arith.mulf %26, %27 : vector<16x32xf32>
    %29 = vector.broadcast %8 : vector<1x32xf32> to vector<16x32xf32>
    %30 = arith.addf %28, %29 : vector<16x32xf32>
    %31 = arith.truncf %30 : vector<16x32xf32> to vector<16x32xbf16>
    %c0_13 = arith.constant 0 : index
    %c0_14 = arith.constant 0 : index
    %c0_15 = arith.constant 0 : index
    %32 = vector.load %arg6[%c0_13, %c0_14, %c0_15] : memref<1x32x96xbf16, #tpu.memory_space<vmem>>, vector<1x32x96xbf16>
    %33 = vector.shape_cast %32 : vector<1x32x96xbf16> to vector<32x96xbf16>
    %cst_16 = arith.constant dense<0.000000e+00> : vector<16x96xf32>
    %34 = tpu.matmul %31, %33, %cst_16 {dimension_numbers = #tpu.dot_dimension_numbers<[1], [0], [0], [1], [0, 0, 1, 1], [], []>} : vector<16x32xbf16>, vector<32x96xbf16>, vector<16x96xf32> -> vector<16x96xf32>
    %35 = arith.truncf %34 : vector<16x96xf32> to vector<16x96xbf16>
    %36 = vector.extract_strided_slice %35 {offsets = [0, 0], sizes = [8, 96], strides = [1, 1]} : vector<16x96xbf16> to vector<8x96xbf16>
    %37 = vector.extract_strided_slice %36 {offsets = [0, 0], sizes = [8, 32], strides = [1, 1]} : vector<8x96xbf16> to vector<8x32xbf16>
    %38 = vector.extract_strided_slice %37 {offsets = [0, 0], sizes = [8, 8], strides = [1, 1]} : vector<8x32xbf16> to vector<8x8xbf16>
    %39 = vector.shape_cast %38 : vector<8x8xbf16> to vector<1x8x8xbf16>
    %40 = vector.extract_strided_slice %37 {offsets = [0, 8], sizes = [8, 8], strides = [1, 1]} : vector<8x32xbf16> to vector<8x8xbf16>
    %41 = vector.shape_cast %40 : vector<8x8xbf16> to vector<1x8x8xbf16>
    %42 = vector.extract_strided_slice %37 {offsets = [0, 16], sizes = [8, 8], strides = [1, 1]} : vector<8x32xbf16> to vector<8x8xbf16>
    %43 = vector.shape_cast %42 : vector<8x8xbf16> to vector<1x8x8xbf16>
    %44 = vector.extract_strided_slice %37 {offsets = [0, 24], sizes = [8, 8], strides = [1, 1]} : vector<8x32xbf16> to vector<8x8xbf16>
    %45 = vector.shape_cast %44 : vector<8x8xbf16> to vector<1x8x8xbf16>
    %46 = tpu.concatenate %39, %41, %43, %45 in 0 : vector<1x8x8xbf16>, vector<1x8x8xbf16>, vector<1x8x8xbf16>, vector<1x8x8xbf16> -> vector<4x8x8xbf16>
    %47 = vector.extract_strided_slice %36 {offsets = [0, 32], sizes = [8, 32], strides = [1, 1]} : vector<8x96xbf16> to vector<8x32xbf16>
    %48 = vector.extract_strided_slice %47 {offsets = [0, 0], sizes = [8, 8], strides = [1, 1]} : vector<8x32xbf16> to vector<8x8xbf16>
    %49 = vector.shape_cast %48 : vector<8x8xbf16> to vector<1x8x8xbf16>
    %50 = vector.extract_strided_slice %47 {offsets = [0, 8], sizes = [8, 8], strides = [1, 1]} : vector<8x32xbf16> to vector<8x8xbf16>
    %51 = vector.shape_cast %50 : vector<8x8xbf16> to vector<1x8x8xbf16>
    %52 = vector.extract_strided_slice %47 {offsets = [0, 16], sizes = [8, 8], strides = [1, 1]} : vector<8x32xbf16> to vector<8x8xbf16>
    %53 = vector.shape_cast %52 : vector<8x8xbf16> to vector<1x8x8xbf16>
    %54 = vector.extract_strided_slice %47 {offsets = [0, 24], sizes = [8, 8], strides = [1, 1]} : vector<8x32xbf16> to vector<8x8xbf16>
    %55 = vector.shape_cast %54 : vector<8x8xbf16> to vector<1x8x8xbf16>
    %56 = tpu.concatenate %49, %51, %53, %55 in 0 : vector<1x8x8xbf16>, vector<1x8x8xbf16>, vector<1x8x8xbf16>, vector<1x8x8xbf16> -> vector<4x8x8xbf16>
    %57 = vector.extract_strided_slice %36 {offsets = [0, 64], sizes = [8, 32], strides = [1, 1]} : vector<8x96xbf16> to vector<8x32xbf16>
    %58 = vector.extract_strided_slice %57 {offsets = [0, 0], sizes = [8, 8], strides = [1, 1]} : vector<8x32xbf16> to vector<8x8xbf16>
    %59 = vector.shape_cast %58 : vector<8x8xbf16> to vector<1x8x8xbf16>
    %60 = vector.extract_strided_slice %57 {offsets = [0, 8], sizes = [8, 8], strides = [1, 1]} : vector<8x32xbf16> to vector<8x8xbf16>
    %61 = vector.shape_cast %60 : vector<8x8xbf16> to vector<1x8x8xbf16>
    %62 = vector.extract_strided_slice %57 {offsets = [0, 16], sizes = [8, 8], strides = [1, 1]} : vector<8x32xbf16> to vector<8x8xbf16>
    %63 = vector.shape_cast %62 : vector<8x8xbf16> to vector<1x8x8xbf16>
    %64 = vector.extract_strided_slice %57 {offsets = [0, 24], sizes = [8, 8], strides = [1, 1]} : vector<8x32xbf16> to vector<8x8xbf16>
    %65 = vector.shape_cast %64 : vector<8x8xbf16> to vector<1x8x8xbf16>
    %66 = tpu.concatenate %59, %61, %63, %65 in 0 : vector<1x8x8xbf16>, vector<1x8x8xbf16>, vector<1x8x8xbf16>, vector<1x8x8xbf16> -> vector<4x8x8xbf16>
    "tpu.trace_start"() <{level = 10 : i32, message = "hqc,hkc->hqk"}> : () -> ()
    %cst_17 = arith.constant dense<0.000000e+00> : vector<4x8x8xf32>
    %67 = tpu.matmul %46, %56, %cst_17 {dimension_numbers = #tpu.dot_dimension_numbers<[2], [2], [1], [1], [0, 0, 0, 1, 1, 1], [0], [0]>} : vector<4x8x8xbf16>, vector<4x8x8xbf16>, vector<4x8x8xf32> -> vector<4x8x8xf32>
    "tpu.trace_stop"() : () -> ()
    %c0_18 = arith.constant 0 : index
    %c0_19 = arith.constant 0 : index
    %68 = vector.load %arg2[%c0_18, %c0_19] : memref<8x8xf32, #tpu.memory_space<vmem>>, vector<8x8xf32>
    %69 = vector.shape_cast %68 : vector<8x8xf32> to vector<1x8x8xf32>
    %70 = vector.broadcast %69 : vector<1x8x8xf32> to vector<4x8x8xf32>
    %71 = arith.mulf %67, %70 : vector<4x8x8xf32>
    %cst_20 = arith.constant dense<0.000000e+00> : vector<8x8xf32>
    %72 = vector.multi_reduction <add>, %71, %cst_20 [0] : vector<4x8x8xf32> to vector<8x8xf32>
    %73 = vector.shape_cast %72 : vector<8x8xf32> to vector<1x8x8xf32>
    %cst_21 = arith.constant 4.000000e+00 : f32
    %74 = vector.broadcast %cst_21 : f32 to vector<1x8x8xf32>
    %75 = arith.divf %73, %74 : vector<1x8x8xf32>
    %76 = vector.broadcast %75 : vector<1x8x8xf32> to vector<4x8x8xf32>
    %77 = arith.subf %71, %76 : vector<4x8x8xf32>
    %78 = arith.mulf %77, %77 : vector<4x8x8xf32>
    %cst_22 = arith.constant dense<0.000000e+00> : vector<8x8xf32>
    %79 = vector.multi_reduction <add>, %78, %cst_22 [0] : vector<4x8x8xf32> to vector<8x8xf32>
    %80 = vector.shape_cast %79 : vector<8x8xf32> to vector<1x8x8xf32>
    %cst_23 = arith.constant 0.333333343 : f32
    %81 = vector.broadcast %cst_23 : f32 to vector<1x8x8xf32>
    %82 = arith.mulf %80, %81 : vector<1x8x8xf32>
    %83 = math.rsqrt %82 : vector<1x8x8xf32>
    %84 = vector.broadcast %83 : vector<1x8x8xf32> to vector<4x8x8xf32>
    %85 = arith.mulf %77, %84 : vector<4x8x8xf32>
    %cst_24 = arith.constant dense<0xFF800000> : vector<4x8xf32>
    %86 = vector.multi_reduction <maximumf>, %85, %cst_24 [2] : vector<4x8x8xf32> to vector<4x8xf32>
    %87 = vector.shape_cast %86 : vector<4x8xf32> to vector<4x8x1xf32>
    %88 = vector.broadcast %87 : vector<4x8x1xf32> to vector<4x8x8xf32>
    %89 = arith.subf %85, %88 : vector<4x8x8xf32>
    %90 = math.exp %89 : vector<4x8x8xf32>
    %cst_25 = arith.constant dense<0.000000e+00> : vector<4x8xf32>
    %91 = vector.multi_reduction <add>, %90, %cst_25 [2] : vector<4x8x8xf32> to vector<4x8xf32>
    %92 = vector.shape_cast %91 : vector<4x8xf32> to vector<4x8x1xf32>
    %93 = tpu.reciprocal %92 {approx = true} : vector<4x8x1xf32> -> vector<4x8x1xf32>
    %94 = vector.broadcast %93 : vector<4x8x1xf32> to vector<4x8x8xf32>
    %95 = arith.mulf %90, %94 : vector<4x8x8xf32>
    %96 = arith.truncf %95 : vector<4x8x8xf32> to vector<4x8x8xbf16>
    "tpu.trace_start"() <{level = 10 : i32, message = "hqk,hkc->hqc"}> : () -> ()
    %cst_26 = arith.constant dense<0.000000e+00> : vector<4x8x8xf32>
    %97 = tpu.matmul %96, %66, %cst_26 {dimension_numbers = #tpu.dot_dimension_numbers<[2], [1], [1], [2], [0, 0, 0, 1, 1, 2], [0], [0]>} : vector<4x8x8xbf16>, vector<4x8x8xbf16>, vector<4x8x8xf32> -> vector<4x8x8xf32>
    "tpu.trace_stop"() : () -> ()
    %98 = vector.extract_strided_slice %97 {offsets = [0, 0, 0], sizes = [1, 8, 8], strides = [1, 1, 1]} : vector<4x8x8xf32> to vector<1x8x8xf32>
    %99 = vector.shape_cast %98 : vector<1x8x8xf32> to vector<8x8xf32>
    %100 = vector.extract_strided_slice %97 {offsets = [1, 0, 0], sizes = [1, 8, 8], strides = [1, 1, 1]} : vector<4x8x8xf32> to vector<1x8x8xf32>
    %101 = vector.shape_cast %100 : vector<1x8x8xf32> to vector<8x8xf32>
    %102 = vector.extract_strided_slice %97 {offsets = [2, 0, 0], sizes = [1, 8, 8], strides = [1, 1, 1]} : vector<4x8x8xf32> to vector<1x8x8xf32>
    %103 = vector.shape_cast %102 : vector<1x8x8xf32> to vector<8x8xf32>
    %104 = vector.extract_strided_slice %97 {offsets = [3, 0, 0], sizes = [1, 8, 8], strides = [1, 1, 1]} : vector<4x8x8xf32> to vector<1x8x8xf32>
    %105 = vector.shape_cast %104 : vector<1x8x8xf32> to vector<8x8xf32>
    %106 = tpu.concatenate %99, %101, %103, %105 in 1 : vector<8x8xf32>, vector<8x8xf32>, vector<8x8xf32>, vector<8x8xf32> -> vector<8x32xf32>
    %107 = arith.truncf %106 : vector<8x32xf32> to vector<8x32xbf16>
    %c0_27 = arith.constant 0 : index
    %c0_28 = arith.constant 0 : index
    %c0_29 = arith.constant 0 : index
    %108 = vector.load %arg7[%c0_27, %c0_28, %c0_29] : memref<1x32x32xbf16, #tpu.memory_space<vmem>>, vector<1x32x32xbf16>
    %109 = vector.shape_cast %108 : vector<1x32x32xbf16> to vector<32x32xbf16>
    %cst_30 = arith.constant dense<0.000000e+00> : vector<8x32xf32>
    %110 = tpu.matmul %107, %109, %cst_30 {dimension_numbers = #tpu.dot_dimension_numbers<[1], [0], [0], [1], [0, 0, 1, 1], [], []>} : vector<8x32xbf16>, vector<32x32xbf16>, vector<8x32xf32> -> vector<8x32xf32>
    %c0_31 = arith.constant 0 : index
    %c0_32 = arith.constant 0 : index
    %c0_33 = arith.constant 0 : index
    %111 = vector.load %arg8[%c0_31, %c0_32, %c0_33] : memref<1x1x32xf32, #tpu.memory_space<vmem>>, vector<1x1x32xf32>
    %112 = vector.shape_cast %111 : vector<1x1x32xf32> to vector<1x32xf32>
    %113 = vector.broadcast %112 : vector<1x32xf32> to vector<8x32xf32>
    %114 = arith.addf %110, %113 : vector<8x32xf32>
    %115 = vector.extract_strided_slice %3 {offsets = [0, 0, 0], sizes = [1, 8, 32], strides = [1, 1, 1]} : vector<2x8x32xf32> to vector<1x8x32xf32>
    %116 = vector.shape_cast %115 : vector<1x8x32xf32> to vector<8x32xf32>
    %117 = arith.addf %116, %114 : vector<8x32xf32>
    %c0_34 = arith.constant 0 : index
    %c0_35 = arith.constant 0 : index
    %c0_36 = arith.constant 0 : index
    %118 = vector.load %arg12[%c0_34, %c0_35, %c0_36] : memref<2x8x32xf32, #tpu.memory_space<vmem>>, vector<1x8x32xf32>
    %119 = vector.shape_cast %118 : vector<1x8x32xf32> to vector<8x32xf32>
    %120 = vector.shape_cast %117 : vector<8x32xf32> to vector<1x8x32xf32>
    tpu.vector_store %arg12[%c0_34, %c0_35, %c0_36], %120 {strides = array<i32>} : memref<2x8x32xf32, #tpu.memory_space<vmem>>, vector<1x8x32xf32>,
    %121 = vector.extract_strided_slice %35 {offsets = [8, 0], sizes = [8, 96], strides = [1, 1]} : vector<16x96xbf16> to vector<8x96xbf16>
    %122 = vector.extract_strided_slice %121 {offsets = [0, 0], sizes = [8, 32], strides = [1, 1]} : vector<8x96xbf16> to vector<8x32xbf16>
    %123 = vector.extract_strided_slice %122 {offsets = [0, 0], sizes = [8, 8], strides = [1, 1]} : vector<8x32xbf16> to vector<8x8xbf16>
    %124 = vector.shape_cast %123 : vector<8x8xbf16> to vector<1x8x8xbf16>
    %125 = vector.extract_strided_slice %122 {offsets = [0, 8], sizes = [8, 8], strides = [1, 1]} : vector<8x32xbf16> to vector<8x8xbf16>
    %126 = vector.shape_cast %125 : vector<8x8xbf16> to vector<1x8x8xbf16>
    %127 = vector.extract_strided_slice %122 {offsets = [0, 16], sizes = [8, 8], strides = [1, 1]} : vector<8x32xbf16> to vector<8x8xbf16>
    %128 = vector.shape_cast %127 : vector<8x8xbf16> to vector<1x8x8xbf16>
    %129 = vector.extract_strided_slice %122 {offsets = [0, 24], sizes = [8, 8], strides = [1, 1]} : vector<8x32xbf16> to vector<8x8xbf16>
    %130 = vector.shape_cast %129 : vector<8x8xbf16> to vector<1x8x8xbf16>
    %131 = tpu.concatenate %124, %126, %128, %130 in 0 : vector<1x8x8xbf16>, vector<1x8x8xbf16>, vector<1x8x8xbf16>, vector<1x8x8xbf16> -> vector<4x8x8xbf16>
    %132 = vector.extract_strided_slice %121 {offsets = [0, 32], sizes = [8, 32], strides = [1, 1]} : vector<8x96xbf16> to vector<8x32xbf16>
    %133 = vector.extract_strided_slice %132 {offsets = [0, 0], sizes = [8, 8], strides = [1, 1]} : vector<8x32xbf16> to vector<8x8xbf16>
    %134 = vector.shape_cast %133 : vector<8x8xbf16> to vector<1x8x8xbf16>
    %135 = vector.extract_strided_slice %132 {offsets = [0, 8], sizes = [8, 8], strides = [1, 1]} : vector<8x32xbf16> to vector<8x8xbf16>
    %136 = vector.shape_cast %135 : vector<8x8xbf16> to vector<1x8x8xbf16>
    %137 = vector.extract_strided_slice %132 {offsets = [0, 16], sizes = [8, 8], strides = [1, 1]} : vector<8x32xbf16> to vector<8x8xbf16>
    %138 = vector.shape_cast %137 : vector<8x8xbf16> to vector<1x8x8xbf16>
    %139 = vector.extract_strided_slice %132 {offsets = [0, 24], sizes = [8, 8], strides = [1, 1]} : vector<8x32xbf16> to vector<8x8xbf16>
    %140 = vector.shape_cast %139 : vector<8x8xbf16> to vector<1x8x8xbf16>
    %141 = tpu.concatenate %134, %136, %138, %140 in 0 : vector<1x8x8xbf16>, vector<1x8x8xbf16>, vector<1x8x8xbf16>, vector<1x8x8xbf16> -> vector<4x8x8xbf16>
    %142 = vector.extract_strided_slice %121 {offsets = [0, 64], sizes = [8, 32], strides = [1, 1]} : vector<8x96xbf16> to vector<8x32xbf16>
    %143 = vector.extract_strided_slice %142 {offsets = [0, 0], sizes = [8, 8], strides = [1, 1]} : vector<8x32xbf16> to vector<8x8xbf16>
    %144 = vector.shape_cast %143 : vector<8x8xbf16> to vector<1x8x8xbf16>
    %145 = vector.extract_strided_slice %142 {offsets = [0, 8], sizes = [8, 8], strides = [1, 1]} : vector<8x32xbf16> to vector<8x8xbf16>
    %146 = vector.shape_cast %145 : vector<8x8xbf16> to vector<1x8x8xbf16>
    %147 = vector.extract_strided_slice %142 {offsets = [0, 16], sizes = [8, 8], strides = [1, 1]} : vector<8x32xbf16> to vector<8x8xbf16>
    %148 = vector.shape_cast %147 : vector<8x8xbf16> to vector<1x8x8xbf16>
    %149 = vector.extract_strided_slice %142 {offsets = [0, 24], sizes = [8, 8], strides = [1, 1]} : vector<8x32xbf16> to vector<8x8xbf16>
    %150 = vector.shape_cast %149 : vector<8x8xbf16> to vector<1x8x8xbf16>
    %151 = tpu.concatenate %144, %146, %148, %150 in 0 : vector<1x8x8xbf16>, vector<1x8x8xbf16>, vector<1x8x8xbf16>, vector<1x8x8xbf16> -> vector<4x8x8xbf16>
    "tpu.trace_start"() <{level = 10 : i32, message = "hqc,hkc->hqk"}> : () -> ()
    %cst_37 = arith.constant dense<0.000000e+00> : vector<4x8x8xf32>
    %152 = tpu.matmul %131, %141, %cst_37 {dimension_numbers = #tpu.dot_dimension_numbers<[2], [2], [1], [1], [0, 0, 0, 1, 1, 1], [0], [0]>} : vector<4x8x8xbf16>, vector<4x8x8xbf16>, vector<4x8x8xf32> -> vector<4x8x8xf32>
    "tpu.trace_stop"() : () -> ()
    %c0_38 = arith.constant 0 : index
    %c0_39 = arith.constant 0 : index
    %153 = vector.load %arg2[%c0_38, %c0_39] : memref<8x8xf32, #tpu.memory_space<vmem>>, vector<8x8xf32>
    %154 = vector.shape_cast %153 : vector<8x8xf32> to vector<1x8x8xf32>
    %155 = vector.broadcast %154 : vector<1x8x8xf32> to vector<4x8x8xf32>
    %156 = arith.mulf %152, %155 : vector<4x8x8xf32>
    %cst_40 = arith.constant dense<0.000000e+00> : vector<8x8xf32>
    %157 = vector.multi_reduction <add>, %156, %cst_40 [0] : vector<4x8x8xf32> to vector<8x8xf32>
    %158 = vector.shape_cast %157 : vector<8x8xf32> to vector<1x8x8xf32>
    %cst_41 = arith.constant 4.000000e+00 : f32
    %159 = vector.broadcast %cst_41 : f32 to vector<1x8x8xf32>
    %160 = arith.divf %158, %159 : vector<1x8x8xf32>
    %161 = vector.broadcast %160 : vector<1x8x8xf32> to vector<4x8x8xf32>
    %162 = arith.subf %156, %161 : vector<4x8x8xf32>
    %163 = arith.mulf %162, %162 : vector<4x8x8xf32>
    %cst_42 = arith.constant dense<0.000000e+00> : vector<8x8xf32>
    %164 = vector.multi_reduction <add>, %163, %cst_42 [0] : vector<4x8x8xf32> to vector<8x8xf32>
    %165 = vector.shape_cast %164 : vector<8x8xf32> to vector<1x8x8xf32>
    %cst_43 = arith.constant 0.333333343 : f32
    %166 = vector.broadcast %cst_43 : f32 to vector<1x8x8xf32>
    %167 = arith.mulf %165, %166 : vector<1x8x8xf32>
    %168 = math.rsqrt %167 : vector<1x8x8xf32>
    %169 = vector.broadcast %168 : vector<1x8x8xf32> to vector<4x8x8xf32>
    %170 = arith.mulf %162, %169 : vector<4x8x8xf32>
    %cst_44 = arith.constant dense<0xFF800000> : vector<4x8xf32>
    %171 = vector.multi_reduction <maximumf>, %170, %cst_44 [2] : vector<4x8x8xf32> to vector<4x8xf32>
    %172 = vector.shape_cast %171 : vector<4x8xf32> to vector<4x8x1xf32>
    %173 = vector.broadcast %172 : vector<4x8x1xf32> to vector<4x8x8xf32>
    %174 = arith.subf %170, %173 : vector<4x8x8xf32>
    %175 = math.exp %174 : vector<4x8x8xf32>
    %cst_45 = arith.constant dense<0.000000e+00> : vector<4x8xf32>
    %176 = vector.multi_reduction <add>, %175, %cst_45 [2] : vector<4x8x8xf32> to vector<4x8xf32>
    %177 = vector.shape_cast %176 : vector<4x8xf32> to vector<4x8x1xf32>
    %178 = tpu.reciprocal %177 {approx = true} : vector<4x8x1xf32> -> vector<4x8x1xf32>
    %179 = vector.broadcast %178 : vector<4x8x1xf32> to vector<4x8x8xf32>
    %180 = arith.mulf %175, %179 : vector<4x8x8xf32>
    %181 = arith.truncf %180 : vector<4x8x8xf32> to vector<4x8x8xbf16>
    "tpu.trace_start"() <{level = 10 : i32, message = "hqk,hkc->hqc"}> : () -> ()
    %cst_46 = arith.constant dense<0.000000e+00> : vector<4x8x8xf32>
    %182 = tpu.matmul %181, %151, %cst_46 {dimension_numbers = #tpu.dot_dimension_numbers<[2], [1], [1], [2], [0, 0, 0, 1, 1, 2], [0], [0]>} : vector<4x8x8xbf16>, vector<4x8x8xbf16>, vector<4x8x8xf32> -> vector<4x8x8xf32>
    "tpu.trace_stop"() : () -> ()
    %183 = vector.extract_strided_slice %182 {offsets = [0, 0, 0], sizes = [1, 8, 8], strides = [1, 1, 1]} : vector<4x8x8xf32> to vector<1x8x8xf32>
    %184 = vector.shape_cast %183 : vector<1x8x8xf32> to vector<8x8xf32>
    %185 = vector.extract_strided_slice %182 {offsets = [1, 0, 0], sizes = [1, 8, 8], strides = [1, 1, 1]} : vector<4x8x8xf32> to vector<1x8x8xf32>
    %186 = vector.shape_cast %185 : vector<1x8x8xf32> to vector<8x8xf32>
    %187 = vector.extract_strided_slice %182 {offsets = [2, 0, 0], sizes = [1, 8, 8], strides = [1, 1, 1]} : vector<4x8x8xf32> to vector<1x8x8xf32>
    %188 = vector.shape_cast %187 : vector<1x8x8xf32> to vector<8x8xf32>
    %189 = vector.extract_strided_slice %182 {offsets = [3, 0, 0], sizes = [1, 8, 8], strides = [1, 1, 1]} : vector<4x8x8xf32> to vector<1x8x8xf32>
    %190 = vector.shape_cast %189 : vector<1x8x8xf32> to vector<8x8xf32>
    %191 = tpu.concatenate %184, %186, %188, %190 in 1 : vector<8x8xf32>, vector<8x8xf32>, vector<8x8xf32>, vector<8x8xf32> -> vector<8x32xf32>
    %192 = arith.truncf %191 : vector<8x32xf32> to vector<8x32xbf16>
    %c0_47 = arith.constant 0 : index
    %c0_48 = arith.constant 0 : index
    %c0_49 = arith.constant 0 : index
    %193 = vector.load %arg7[%c0_47, %c0_48, %c0_49] : memref<1x32x32xbf16, #tpu.memory_space<vmem>>, vector<1x32x32xbf16>
    %194 = vector.shape_cast %193 : vector<1x32x32xbf16> to vector<32x32xbf16>
    %cst_50 = arith.constant dense<0.000000e+00> : vector<8x32xf32>
    %195 = tpu.matmul %192, %194, %cst_50 {dimension_numbers = #tpu.dot_dimension_numbers<[1], [0], [0], [1], [0, 0, 1, 1], [], []>} : vector<8x32xbf16>, vector<32x32xbf16>, vector<8x32xf32> -> vector<8x32xf32>
    %c0_51 = arith.constant 0 : index
    %c0_52 = arith.constant 0 : index
    %c0_53 = arith.constant 0 : index
    %196 = vector.load %arg8[%c0_51, %c0_52, %c0_53] : memref<1x1x32xf32, #tpu.memory_space<vmem>>, vector<1x1x32xf32>
    %197 = vector.shape_cast %196 : vector<1x1x32xf32> to vector<1x32xf32>
    %198 = vector.broadcast %197 : vector<1x32xf32> to vector<8x32xf32>
    %199 = arith.addf %195, %198 : vector<8x32xf32>
    %200 = vector.extract_strided_slice %3 {offsets = [1, 0, 0], sizes = [1, 8, 32], strides = [1, 1, 1]} : vector<2x8x32xf32> to vector<1x8x32xf32>
    %201 = vector.shape_cast %200 : vector<1x8x32xf32> to vector<8x32xf32>
    %202 = arith.addf %201, %199 : vector<8x32xf32>
    %c1 = arith.constant 1 : index
    %c0_54 = arith.constant 0 : index
    %c0_55 = arith.constant 0 : index
    %203 = vector.load %arg12[%c1, %c0_54, %c0_55] : memref<2x8x32xf32, #tpu.memory_space<vmem>>, vector<1x8x32xf32>
    %204 = vector.shape_cast %203 : vector<1x8x32xf32> to vector<8x32xf32>
    %205 = vector.shape_cast %202 : vector<8x32xf32> to vector<1x8x32xf32>
    tpu.vector_store %arg12[%c1, %c0_54, %c0_55], %205 {strides = array<i32>} : memref<2x8x32xf32, #tpu.memory_space<vmem>>, vector<1x8x32xf32>,
    %c1_i32 = arith.constant 1 : i32
    %206 = arith.cmpi eq, %arg1, %c1_i32 : i32
    %207 = arith.extui %206 : i1 to i32
    %c0_i32_56 = arith.constant 0 : i32
    %208 = arith.cmpi ne, %207, %c0_i32_56 : i32
    scf.if %208 {
      %c0_57 = arith.constant 0 : index
      %c0_58 = arith.constant 0 : index
      %c0_59 = arith.constant 0 : index
      %209 = vector.load %arg12[%c0_57, %c0_58, %c0_59] : memref<2x8x32xf32, #tpu.memory_space<vmem>>, vector<2x8x32xf32>
      %c0_60 = arith.constant 0 : index
      %c0_61 = arith.constant 0 : index
      %210 = vector.load %arg9[%c0_60, %c0_61] : memref<1x32xf32, #tpu.memory_space<vmem>>, vector<1x32xf32>
      %c0_62 = arith.constant 0 : index
      %c0_63 = arith.constant 0 : index
      %211 = vector.load %arg10[%c0_62, %c0_63] : memref<1x32xf32, #tpu.memory_space<vmem>>, vector<1x32xf32>
      %cst_64 = arith.constant dense<0.000000e+00> : vector<2x8xf32>
      %212 = vector.multi_reduction <add>, %209, %cst_64 [2] : vector<2x8x32xf32> to vector<2x8xf32>
      %213 = vector.shape_cast %212 : vector<2x8xf32> to vector<2x8x1xf32>
      %cst_65 = arith.constant 3.200000e+01 : f32
      %214 = vector.broadcast %cst_65 : f32 to vector<2x8x1xf32>
      %215 = arith.divf %213, %214 : vector<2x8x1xf32>
      %216 = vector.broadcast %215 : vector<2x8x1xf32> to vector<2x8x32xf32>
      %217 = arith.subf %209, %216 : vector<2x8x32xf32>
      %218 = arith.mulf %217, %217 : vector<2x8x32xf32>
      %cst_66 = arith.constant dense<0.000000e+00> : vector<2x8xf32>
      %219 = vector.multi_reduction <add>, %218, %cst_66 [2] : vector<2x8x32xf32> to vector<2x8xf32>
      %220 = vector.shape_cast %219 : vector<2x8xf32> to vector<2x8x1xf32>
      %cst_67 = arith.constant 3.200000e+01 : f32
      %221 = vector.broadcast %cst_67 : f32 to vector<2x8x1xf32>
      %222 = arith.divf %220, %221 : vector<2x8x1xf32>
      %223 = vector.broadcast %215 : vector<2x8x1xf32> to vector<2x8x32xf32>
      %224 = arith.subf %209, %223 : vector<2x8x32xf32>
      %cst_68 = arith.constant 9.99999974E-6 : f32
      %225 = vector.broadcast %cst_68 : f32 to vector<2x8x1xf32>
      %226 = arith.addf %222, %225 : vector<2x8x1xf32>
      %227 = math.rsqrt %226 : vector<2x8x1xf32>
      %228 = vector.broadcast %227 : vector<2x8x1xf32> to vector<2x8x32xf32>
      %229 = arith.mulf %224, %228 : vector<2x8x32xf32>
      %230 = vector.shape_cast %210 : vector<1x32xf32> to vector<1x1x32xf32>
      %231 = vector.broadcast %230 : vector<1x1x32xf32> to vector<2x8x32xf32>
      %232 = arith.mulf %229, %231 : vector<2x8x32xf32>
      %233 = vector.shape_cast %211 : vector<1x32xf32> to vector<1x1x32xf32>
      %234 = vector.broadcast %233 : vector<1x1x32xf32> to vector<2x8x32xf32>
      %235 = arith.addf %232, %234 : vector<2x8x32xf32>
      %c0_69 = arith.constant 0 : index
      %c0_70 = arith.constant 0 : index
      %c0_71 = arith.constant 0 : index
      %236 = vector.load %arg11[%c0_69, %c0_70, %c0_71] : memref<2x8x32xf32, #tpu.memory_space<vmem>>, vector<2x8x32xf32>
      tpu.vector_store %arg11[%c0_69, %c0_70, %c0_71], %235 {strides = array<i32>} : memref<2x8x32xf32, #tpu.memory_space<vmem>>, vector<2x8x32xf32>,
    } else {
    }
    return
  }
  func.func @transform_0(%arg0: i32, %arg1: i32) -> (i32, i32) {
    %c0_i32 = arith.constant 0 : i32
    %c0_i32_0 = arith.constant 0 : i32
    %c0_i32_1 = arith.constant 0 : i32
    return %c0_i32, %c0_i32_0 : i32, i32
  }
  func.func @transform_1(%arg0: i32, %arg1: i32) -> (i32, i32, i32) {
    %c0_i32 = arith.constant 0 : i32
    %c0_i32_0 = arith.constant 0 : i32
    %c0_i32_1 = arith.constant 0 : i32
    return %arg0, %c0_i32, %c0_i32_0 : i32, i32, i32
  }
  func.func @transform_2(%arg0: i32, %arg1: i32) -> (i32, i32, i32) {
    %c0_i32 = arith.constant 0 : i32
    %c0_i32_0 = arith.constant 0 : i32
    %c0_i32_1 = arith.constant 0 : i32
    return %arg1, %c0_i32, %c0_i32_0 : i32, i32, i32
  }
  func.func @transform_3(%arg0: i32, %arg1: i32) -> (i32, i32, i32) {
    %c0_i32 = arith.constant 0 : i32
    %c0_i32_0 = arith.constant 0 : i32
    %c0_i32_1 = arith.constant 0 : i32
    return %arg1, %c0_i32, %c0_i32_0 : i32, i32, i32
  }
  func.func @transform_4(%arg0: i32, %arg1: i32) -> (i32, i32, i32) {
    %c0_i32 = arith.constant 0 : i32
    %c0_i32_0 = arith.constant 0 : i32
    %c0_i32_1 = arith.constant 0 : i32
    return %arg1, %c0_i32, %c0_i32_0 : i32, i32, i32
  }
  func.func @transform_5(%arg0: i32, %arg1: i32) -> (i32, i32, i32) {
    %c0_i32 = arith.constant 0 : i32
    %c0_i32_0 = arith.constant 0 : i32
    %c0_i32_1 = arith.constant 0 : i32
    return %arg1, %c0_i32, %c0_i32_0 : i32, i32, i32
  }
  func.func @transform_6(%arg0: i32, %arg1: i32) -> (i32, i32, i32) {
    %c0_i32 = arith.constant 0 : i32
    %c0_i32_0 = arith.constant 0 : i32
    %c0_i32_1 = arith.constant 0 : i32
    return %arg1, %c0_i32, %c0_i32_0 : i32, i32, i32
  }
  func.func @transform_7(%arg0: i32, %arg1: i32) -> (i32, i32) {
    %c0_i32 = arith.constant 0 : i32
    %c0_i32_0 = arith.constant 0 : i32
    %c0_i32_1 = arith.constant 0 : i32
    return %c0_i32, %c0_i32_0 : i32, i32
  }
  func.func @transform_8(%arg0: i32, %arg1: i32) -> (i32, i32) {
    %c0_i32 = arith.constant 0 : i32
    %c0_i32_0 = arith.constant 0 : i32
    %c0_i32_1 = arith.constant 0 : i32
    return %c0_i32, %c0_i32_0 : i32, i32
  }
  func.func @transform_9(%arg0: i32, %arg1: i32) -> (i32, i32, i32) {
    %c0_i32 = arith.constant 0 : i32
    %c0_i32_0 = arith.constant 0 : i32
    %c0_i32_1 = arith.constant 0 : i32
    return %arg0, %c0_i32, %c0_i32_0 : i32, i32, i32
  }
}

</mosaic_0001>

<bundles_post_ra>
// kernel: tpu_custom_call.1
= control target key start
LH: loop header
LB: loop body
LE: loop exit
PB: predicated region body
PF: predicated region fallthrough
CT: control target
= control target key end

     0   :  { %s3093_s0 = inlined_call_operand.hbm [shape: f32[8,8], index: 0, kind: input, shape index: {}]   ;;  %s3094_s1 = inlined_call_operand.hbm [shape: f32[2,8,32], index: 1, kind: input, shape index: {}]   ;;  %s3095_s2 = inlined_call_operand.vmem [shape: f32[2,1,32], index: 2, kind: input, shape index: {}]   ;;  %s3096_s3 = inlined_call_operand.vmem [shape: f32[2,1,32], index: 3, kind: input, shape index: {}]   ;;  %s3097_s4 = inlined_call_operand.hbm [shape: bf16[2,32,96], index: 4, kind: input, shape index: {}]   ;;  %s3098_s5 = inlined_call_operand.hbm [shape: bf16[2,32,32], index: 5, kind: input, shape index: {}]   ;;  %s3099_s6 = inlined_call_operand.vmem [shape: f32[2,1,32], index: 6, kind: input, shape index: {}]   ;;  %s3100_s7 = inlined_call_operand.vmem [shape: f32[1,32], index: 7, kind: input, shape index: {}]   ;;  %s3101_s8 = inlined_call_operand.vmem [shape: f32[1,32], index: 8, kind: input, shape index: {}]   ;;  %s3102_s9 = inlined_call_operand.hbm [shape: f32[2,8,32], index: 9, kind: output, shape index: {}]  }
   0x1   :  { %3115 = sst [smem:[#allocation18_spill]] %s3093_s0 }
   0x2   :  { %3116 = sst [smem:[#allocation19_spill]] %s3097_s4 }
   0x3   :  { %3117 = sst [smem:[#allocation20_spill]] %s3102_s9 }
   0x4   :  { %14 = vsyncpa [#allocation4], 0 }
   0x5   :  { %15 = vsyncpa [#allocation7], 0 }
   0x6   :  { %16 = vsyncpa [#allocation5], 0  ;;  %s2545_s30 = smov 0   ;;  %s2547_s10 = smov 0  }
   0x7   :  { %s2549_s11 = smov 0   ;;  %s2551_s12 = smov 0  }
   0x8   :  { %s2553_s13 = smov 0   ;;  %s2555_s14 = smov 0  }
   0x9 LB: > { %3118 = sst [smem:[#allocation15_spill]] %s2461_s11  ;;  %s2574_s15 = sadd.s32 4294967295, %s2473_s14   ;;  %s2473_s14 = sphi %s2555_s14, %s22_s14   ;;  %s2469_s13 = sphi %s2553_s13, %s3150_s13   ;;  %s2465_s12 = sphi %s2551_s12, %s3149_s12   ;;  %s2461_s11 = sphi %s2549_s11, %s3148_s11   ;;  %s2457_s10 = sphi %s2547_s10, %s3147_s10   ;;  %s2453_s30 = sphi %s2545_s30, %s3146_s30  }
   0xa   : > { %s140_s16 = sadd.s32 1, %s2461_s11  ;;  %p147_p0 = scmp.ne.s32.totalorder %s2461_s11, %s2457_s10 }
   0xb   : > { %p148_p1 = scmp.eq.s32.totalorder %s2473_s14, 0  ;;  %p153_p2 = scmp.ne.s32.totalorder %s2457_s10, %s2453_s30 }
   0xc   : > { %p3103_p3 = scmp.eq.s32.totalorder %s2574_s15, 0  ;;  %p1901_p5 = scmp.ge.s32.totalorder %s2473_s14, 1 }
   0xd   : > { %p149_p4 = por %p148_p1, %p147_p0  ;;  %p284_p7 = scmp.lt.s32.totalorder %s2473_s14, 3 }
   0xe   : > { %p2585_p6 = por %p3103_p3, %p153_p2  ;;  %s2475_s19 = smov [#allocation3]  }
   0xf   : > { %p2590_p8 = pnand %p1901_p5, %p284_p7  ;;  %s297_s20 = sshll.u32 %s2475_s19, 4  ;;  %s298_s20 = int_to_ptr.vmem [resolvable:$true] %s297_s20 }
  0x10   : > { %s3119_s17 = scalar_select %p2585_p6, 1, 0 }
  0x11   : > { %s3120_s18 = scalar_select %p2590_p8, 1, 0 }
  0x12   : > { %p2132_p9 = pneg %p2590_p8  ;;  %p2148_p10 = scmp.lt.s32.totalorder %s2473_s14, 2 }
  0x13   : > { %s3123_s0 = sld [smem:[#allocation18_spill]] }
  0x14   : > { %p2600_p11 = pnand %p2132_p9, %p3103_p3  ;;  %p2604_p12 = pnand %p2148_p10, %p149_p4 }
  0x16   : > { %s3122_s23 = scalar_select %p2604_p12, 1, 0 }
  0x17   : > { %p3110_p0 = pneg %p2600_p11 }
  0x19   : > { %s2269_s26 = scalar_lea.hbm %s3123_s0, 128 }
  0x1a   : > { %p2270_p13 = scmp.ne.s32.totalorder %s3123_s0, %s2269_s26  ;;  %p2276_p4 = scmp.lt.u32.totalorder %s2269_s26, %s3123_s0 }
  0x1c   : > { %p2272_p1 = pnand %p3110_p0, %p2270_p13 }
  0x1e   : > { %p2273_p2 = pneg %p2272_p1 }
  0x20   : > { %p2278_p5 = pnand %p2276_p4, %p2273_p2 }
  0x22   : > { %2281 = shalt.err (!%p2278_p5)
}
  0x23   : > { %s2282_s19 = scalar_lea.vmem %s298_s20, 128  ;;  %p2290_p3 = scmp.lt.s32.totalorder %s298_s20, %s298_s20 }
  0x24   : > { %p2283_p7 = scmp.ne.s32.totalorder %s298_s20, %s2282_s19  ;;  %p2291_p6 = scmp.lt.s32.totalorder %s2282_s19, %s2282_s19 }
  0x26   : > { %p2285_p9 = pnand %p2283_p7, %p3110_p0  ;;  %p2292_p8 = por %p2291_p6, %p2290_p3 }
  0x28   : > { %p2286_p10 = pneg %p2285_p9 }
  0x2a   : > { %p2293_p12 = pnand %p2292_p8, %p2286_p10 }
  0x2c   : > { %2296 = shalt.err (!%p2293_p12)
}
  0x2d   : > { %2135 = dma.hbm_to_vmem [thread:$0]  (!%p2600_p11), %s3123_s0, 128, %s298_s20, [#allocation4]  }
  0x2e   : > { %s31_s26 = sadd.s32 1, %s2469_s13  ;;  %s344_s27 = sand.u32 1, %s2461_s11  }
  0x2f   : > { %p32_p3 = scmp.ge.s32.totalorder %s31_s26, 2  ;;  %s2632_s28 = sshll.u32 %s344_s27, 4 }
  0x30   : > { %s3108_s29 = sshll.u32 %s2469_s13, 8  ;;  %s3125_s4 = sld [smem:[#allocation19_spill]] }
  0x31   : > { %s3152_s26 = smov (%p32_p3, %s31_s26), 0  ;;  %s346_s20 = scalar_lea.vmem [#allocation8], %s2632_s28 }
  0x32   : > { %3124 = sst [smem:[#allocation16_spill]] %s3152_s26  ;;  %s353_s25 = sshll.u32 %s346_s20, 4  ;;  %s2647_s25 = int_to_ptr.vmem [resolvable:$true] %s353_s25 }
  0x33   : > { %s137_s21 = ssub.s32 %s2469_s13, %s3152_s26  ;;  %s3127_s0 = sand.u32 1, %s2473_s14  }
  0x34   : > { %p138_p6 = scmp.eq.s32.totalorder %s137_s21, 0  ;;  %s2656_s9 = scalar_lea.sflag [#allocation4], %s3127_s0 }
  0x35   : > { %p3128_p12 = scmp.ne.s32.totalorder %s3122_s23, 0 }
  0x36   : > { %s2642_s24 = scalar_lea.hbm %s3125_s4, %s3108_s29  ;;  %s2302_s29 = scalar_lea.hbm %s3125_s4, 512 }
  0x37   : > { %s2652_s27 = scalar_select %p138_p6, %s2461_s11, %s140_s16  }
  0x38   : > { %s2297_s30 = scalar_lea.hbm %s2642_s24, 256  ;;  %p3112_p13 = pneg %p3128_p12 }
  0x39   : > { %3126 = sst [smem:[#allocation17_spill]] %s2652_s27  ;;  %p2298_p8 = scmp.ne.s32.totalorder %s2642_s24, %s2297_s30 }
  0x3a   : > { %p2303_p4 = scmp.lt.u32.totalorder %s2642_s24, %s3125_s4  ;;  %p2304_p5 = scmp.lt.u32.totalorder %s2302_s29, %s2297_s30 }
  0x3b   : > { %p2300_p1 = pnand %p3112_p13, %p2298_p8  ;;  %p2306_p9 = scmp.lt.u32.totalorder %s2297_s30, %s2642_s24 }
  0x3c   : > { %p2305_p7 = por %p2304_p5, %p2303_p4 }
  0x3d   : > { %p2301_p2 = pneg %p2300_p1 }
  0x3e   : > { %p2307_p10 = por %p2306_p9, %p2305_p7 }
  0x40   : > { %p2308_p3 = pnand %p2307_p10, %p2301_p2 }
  0x42   : > { %2311 = shalt.err (!%p2308_p3)
}
  0x43   : > { %s2312_s0 = scalar_lea.vmem %s2647_s25, 256  ;;  %s2476_s16 = smov [#allocation8]  }
  0x44   : > { %p2313_p6 = scmp.ne.s32.totalorder %s2647_s25, %s2312_s0  ;;  %s2317_s19 = sshll.u32 %s2476_s16, 4  ;;  %s2318_s19 = int_to_ptr.vmem [resolvable:$false] %s2317_s19 }
  0x45   : > { %s2319_s26 = scalar_lea.vmem %s2318_s19, 512  ;;  %p2320_p0 = scmp.lt.s32.totalorder %s2647_s25, %s2318_s19 }
  0x46   : > { %p2315_p8 = pnand %p2313_p6, %p3112_p13  ;;  %p2321_p4 = scmp.lt.s32.totalorder %s2319_s26, %s2312_s0 }
  0x48   : > { %p2316_p1 = pneg %p2315_p8  ;;  %p2322_p5 = por %p2321_p4, %p2320_p0 }
  0x4a   : > { %p2323_p7 = pnand %p2322_p5, %p2316_p1 }
  0x4c   : > { %2326 = shalt.err (!%p2323_p7)
}
  0x4d   : > { %s3114_s29 = smov 64   ;;  %s2478_s30 = smov 4  }
  0x4e   : > { %2142 = dma.hbm_to_vmem [thread:$0]  (!%p3128_p12), %s2642_s24, 256, %s2647_s25, %s2656_s9, %s3114_s29, %s3114_s29, %s2478_s30  }
  0x4f   : > { %s2479_s20 = smov [#allocation6]   ;;  %s2327_s19 = scalar_lea.hbm %s3094_s1, 256 }
  0x50   : > { %s310_s21 = sshll.u32 %s2479_s20, 4  ;;  %p2328_p0 = scmp.ne.s32.totalorder %s3094_s1, %s2327_s19  ;;  %s311_s21 = int_to_ptr.vmem [resolvable:$true] %s310_s21 }
  0x51   : > { %p3129_p2 = pneg %p2600_p11  ;;  %p2334_p3 = scmp.lt.u32.totalorder %s2327_s19, %s3094_s1 }
  0x53   : > { %p2330_p9 = pnand %p2328_p0, %p3129_p2 }
  0x55   : > { %p2331_p10 = pneg %p2330_p9 }
  0x57   : > { %p2336_p6 = pnand %p2334_p3, %p2331_p10 }
  0x59   : > { %2339 = shalt.err (!%p2336_p6)
}
  0x5a   : > { %s2340_s24 = scalar_lea.vmem %s311_s21, 256  ;;  %p3130_p1 = pmov %p3129_p2 }
  0x5b   : > { %p2341_p8 = scmp.ne.s32.totalorder %s311_s21, %s2340_s24  ;;  %p2348_p7 = scmp.lt.s32.totalorder %s311_s21, %s311_s21 }
  0x5c   : > { %p2349_p13 = scmp.lt.s32.totalorder %s2340_s24, %s2340_s24 }
  0x5d   : > { %p2343_p4 = pnand %p2341_p8, %p3130_p1 }
  0x5e   : > { %p2350_p12 = por %p2349_p13, %p2348_p7 }
  0x5f   : > { %p2344_p5 = pneg %p2343_p4 }
  0x61   : > { %p2351_p0 = pnand %p2350_p12, %p2344_p5 }
  0x63   : > { %2354 = shalt.err (!%p2351_p0)
}
  0x64   : > { %s2480_s4 = smov 128   ;;  %s2481_s11 = smov 8  }
  0x65   : > { %2138 = dma.hbm_to_vmem [thread:$0]  (!%p2600_p11), %s3094_s1, 256, %s311_s21, [#allocation7], %s2480_s4, %s2480_s4, %s2481_s11  }
  0x66   : > { %s3131_s20 = sshll.u32 %s2469_s13, 8  ;;  %s367_s26 = scalar_lea.vmem [#allocation9], %s2632_s28 }
  0x67   : > { %s2712_s19 = scalar_lea.hbm %s3098_s5, %s3131_s20  ;;  %s374_s24 = sshll.u32 %s367_s26, 4  ;;  %s2715_s24 = int_to_ptr.vmem [resolvable:$true] %s374_s24 }
  0x68   : > { %s2355_s29 = scalar_lea.hbm %s2712_s19, 256  ;;  %p3132_p13 = scmp.ne.s32.totalorder %s3122_s23, 0 }
  0x69   : > { %p2356_p12 = scmp.ne.s32.totalorder %s2712_s19, %s2355_s29  ;;  %s2360_s4 = scalar_lea.hbm %s3098_s5, 512 }
  0x6a   : > { %p3133_p2 = pneg %p3132_p13  ;;  %p2361_p10 = scmp.lt.u32.totalorder %s2712_s19, %s3098_s5 }
  0x6b   : > { %p2362_p3 = scmp.lt.u32.totalorder %s2360_s4, %s2355_s29  ;;  %p2364_p8 = scmp.lt.u32.totalorder %s2355_s29, %s2712_s19 }
  0x6c   : > { %p2358_p9 = pnand %p2356_p12, %p3133_p2 }
  0x6d   : > { %p2363_p6 = por %p2362_p3, %p2361_p10 }
  0x6e   : > { %p2359_p11 = pneg %p2358_p9 }
  0x6f   : > { %p2365_p1 = por %p2364_p8, %p2363_p6 }
  0x71   : > { %p2366_p4 = pnand %p2365_p1, %p2359_p11 }
  0x73   : > { %2369 = shalt.err (!%p2366_p4)
}
  0x74   : > { %s2370_s28 = scalar_lea.vmem %s2715_s24, 256  ;;  %p3134_p7 = pmov %p3133_p2 }
  0x75   : > { %p2371_p5 = scmp.ne.s32.totalorder %s2715_s24, %s2370_s28  ;;  %s2482_s27 = smov [#allocation9]  }
  0x76   : > { %s2375_s20 = sshll.u32 %s2482_s27, 4  ;;  %s2376_s20 = int_to_ptr.vmem [resolvable:$false] %s2375_s20 }
  0x77   : > { %p2373_p0 = pnand %p2371_p5, %p3134_p7  ;;  %s2377_s16 = scalar_lea.vmem %s2376_s20, 512 }
  0x78   : > { %p2378_p2 = scmp.lt.s32.totalorder %s2715_s24, %s2376_s20  ;;  %p2379_p9 = scmp.lt.s32.totalorder %s2377_s16, %s2370_s28 }
  0x79   : > { %p2374_p12 = pneg %p2373_p0 }
  0x7a   : > { %p2380_p10 = por %p2379_p9, %p2378_p2 }
  0x7c   : > { %p2381_p3 = pnand %p2380_p10, %p2374_p12 }
  0x7e   : > { %2384 = shalt.err (!%p2381_p3)
}
  0x7f   : > { %s3135_s29 = smov 64   ;;  %p3136_p11 = scmp.ne.s32.totalorder %s3120_s18, 0 }
  0x80   : > { %2145 = dma.hbm_to_vmem [thread:$0]  (!%p3132_p13), %s2712_s19, 256, %s2715_s24, %s2656_s9, %s3135_s29, %s3135_s29, %s2478_s30  }
  0x81   : > { %392 = sbr.rel (%p3136_p11) target bundleno = 3375 (0xd2f), region = 56  ;;  %p3137_p6 = scmp.eq.s32.totalorder (!%p3136_p11), %s2574_s15, 0 }
  0x88   : > { %2436 = dma.done.wait (%p3137_p6), [#allocation4], 128   ;;  %p3138_p8 = pmov %p3137_p6 }
  0x89   : > { %p3139_p1 = pmov %p3137_p6 }
  0x8a   : > { %2438 = vsyncadd (%p3138_p8), [#allocation4], 4294967168 }
  0x8b   : > { %2440 = dma.done.wait (%p3139_p1), [#allocation7], 256   ;;  %p3140_p4 = pmov %p3139_p1 }
  0x8c   : > { %s402_s23 = sand.u32 1, %s2574_s15   ;;  %s404_s9 = sand.u32 1, %s2457_s10  }
  0x8d   : > { %2442 = vsyncadd (%p3140_p4), [#allocation7], 4294967040  ;;  %s2756_s30 = sshll.u32 %s404_s9, 4  ;;  %s403_s18 = scalar_lea.sflag [#allocation4], %s402_s23 }
  0x8e   : > { %s406_s0 = scalar_lea.vmem [#allocation8], %s2756_s30  ;;  %p3141_p13 = scmp.ne.s32.totalorder %s3119_s17, 0 }
  0x90   : > { %2444 = dma.done.wait (%p3141_p13), %s403_s18, 512  }
  0x91   : > { %2446 = vsyncadd (%p3141_p13), %s403_s18, 4294966784  ;;  %p460_p5 = scmp.lt.s32.totalorder %s2465_s12, 1  ;;  %s2780_s27 = scalar_lea.vmem [#allocation9], %s2756_s30 }
  0x92   : > { %p1916_p7 = scmp.ne.s32.totalorder %s2465_s12, 0 }
  0x93   : > { %s2765_s19 = scalar_select %p460_p5, %s2465_s12, 1 }
  0x94   : > { %474 = sbr.rel (%p1916_p7) target bundleno = 155 (0x9b), region = 76  ;;  %v475_v0 = vld [vmem:[#allocation6] sm:$0xff] (!%p1916_p7)  ;;  %vm477_vm0 = vcmask (!%p1916_p7), 261120   ;;  %v476_v1 = vld [vmem:[#allocation6 + $0x8] sm:$0xff] (!%p1916_p7) }
  0x95   : > { %s462_s22 = scalar_lea.vmem %s3095_s2, %s2765_s19  ;;  %s465_s11 = scalar_lea.vmem %s3096_s3, %s2765_s19  ;;  %478 = vst.msk [vmem:[#allocation2] sm:$0xff] (!%p1916_p7), %vm477_vm0, %v475_v0  ;;  %479 = vst.msk [vmem:[#allocation2 + $0x8] sm:$0xff] (!%p1916_p7), %vm477_vm0, %v476_v1 }
  0x96   : > { %s468_s28 = scalar_lea.vmem %s3099_s6, %s2765_s19 }
  0x9b PF: > { %vm484_vm1 = vcmask 261120   ;;  %v2219_v16 = vld [vmem:[%s406_s0] sm:$0xff]   ;;  %v2483_v17 = vmov 0.0   ;;  %v2220_v18 = vld [vmem:[%s406_s0 + $0x8] sm:$0xff]   ;;  %vm2484_vm2 = vmmov 0   ;;  %s2485_s9 = smov 112  }
  0x9c   : > { %v2783_v2 = vld [vmem:[#allocation2] sm:$0xff]  ;;  %v2785_v3 = vld [vmem:[#allocation2 + $0x8] sm:$0xff]  ;;  %1996 = vmatprep.subr.bf16.mxu0 %v2483_v17  ;;  %2004 = vmatprep.subr.bf16.mxu1 %v2483_v17  ;;  %s2486_s30 = smov 120   ;;  %s2487_s18 = smov 104   ;;  %vm599_vm3 = vcmask 64512   ;;  %v2863_v56 = vld [vmem:[#allocation3] sm:$0xff] }
  0x9d   : > { %v485_v4 = vsel %vm484_vm1, %v2783_v2, 0.0  ;;  %v488_v5 = vsel %vm484_vm1, %v2785_v3, 0.0  ;;  %1997 = vmatpush3.bf16.msra.mxu0 %v2219_v16  ;;  %2000 = vmatprep.mubr.msk.bf16.mxu0 %vm2484_vm2, %v2483_v17  ;;  %v1917_v27 = vld [vmem:[%s462_s22] ss:$0 sm:$0xff]  ;;  %s2488_s0 = smov 96   ;;  %s2489_s26 = smov 64  }
  0x9e   : > { %486 = vadd.xlane.f32.xlu0 %v485_v4  ;;  %1998 = vmatprep.subr.bf16.mxu0 %v2483_v17  ;;  %v1918_v31 = vld [vmem:[%s465_s11] ss:$0 sm:$0xff]  ;;  %vm878_vm4 = vcmask 1043456   ;;  %s2490_s24 = smov 8   ;;  %s2491_s22 = smov 16   ;;  %vm1079_vm5 = vcmask 130048  }
  0x9f   : > { %2006 = vmatprep.mubr.msk.bf16.mxu1 %vm2484_vm2, %v2483_v17  ;;  %s2492_s21 = smov 24   ;;  %vm1081_vm6 = vcmask 195584   ;;  %p1946_p0 = scmp.ne.s32.totalorder %s2465_s12, 1 }
  0xa1   : > { %1999 = vmatpush3.bf16.msra.mxu0 %v2220_v18 }
  0xa2   : > { %489 = vadd.xlane.f32.xlu0 %v488_v5  ;;  %2010 = vmatprep.subr.bf16.mxu0 %v2483_v17 }
 0x12b   : > { %v487_v6 = vpop.xlane.xlu0 %486 }
 0x12c   : > { %v492_v7 = vmul.f32 0.03125, %v487_v6 }
 0x12e   : > { %v494_v8 = vsub.f32 %v2783_v2, %v492_v7 }
 0x12f   : > { %v490_v9 = vpop.xlane.xlu0 %489 }
 0x130   : > { %v493_v10 = vmul.f32 0.03125, %v490_v9  ;;  %v496_v11 = vmul.f32 %v494_v8, %v494_v8 }
 0x132   : > { %v495_v12 = vsub.f32 %v2785_v3, %v493_v10  ;;  %v498_v13 = vsel %vm484_vm1, %v496_v11, 0.0 }
 0x133   : > { %499 = vadd.xlane.f32.xlu1 %v498_v13 }
 0x134   : > { %v497_v14 = vmul.f32 %v495_v12, %v495_v12 }
 0x136   : > { %v501_v15 = vsel %vm484_vm1, %v497_v14, 0.0 }
 0x137   : > { %502 = vadd.xlane.f32.xlu1 %v501_v15 }
 0x1c0   : > { %v500_v19 = vpop.xlane.xlu1 %499 }
 0x1c1   : > { %v504_v20 = vmul.f32 0.03125, %v500_v19 }
 0x1c3   : > { %v506_v21 = vadd.f32 1e-05, %v504_v20 }
 0x1c4   : > { %v503_v22 = vpop.xlane.xlu1 %502 }
 0x1c5   : > { %2225 = vrsqrt.f32 %v506_v21  ;;  %v505_v23 = vmul.f32 0.03125, %v503_v22 }
 0x1c7   : > { %v507_v24 = vadd.f32 1e-05, %v505_v23 }
 0x1c9   : > { %2227 = vrsqrt.f32 %v507_v24 }
 0x1cf   : > { %v2226_v25 = vpop.eup %2225 }
 0x1d0   : > { %v510_v26 = vmul.f32 %v2226_v25, %v494_v8 }
 0x1d2   : > { %v518_v30 = vmul.f32 %v1917_v27, %v510_v26 }
 0x1d3   : > { %v2228_v28 = vpop.eup %2227 }
 0x1d4   : > { %v511_v29 = vmul.f32 %v2228_v28, %v495_v12  ;;  %v526_v33 = vadd.f32 %v1918_v31, %v518_v30 }
 0x1d6   : > { %v519_v32 = vmul.f32 %v1917_v27, %v511_v29 }
 0x1d8   : > { %v527_v34 = vadd.f32 %v1918_v31, %v519_v32 }
 0x1da   : > { %v528_v35 = vpack.c.bf16 %v527_v34, %v526_v33 }
 0x1dc   : > { %2001 = vmatmul.mubr.msk.bf16.vlgmr.msra.gmra.mrb[0].mxu0 %vm484_vm1, %v528_v35 }
 0x1dd   : > { %2012 = vmatprep.mubr.msk.bf16.mxu0 %vm2484_vm2, %v2483_v17 }
 0x2af   : > { %v582_v36 = vpop.f32.mrb[0].mxu0 }
 0x2b0   : > { %v2002_v37 = vpop.f32.mrb[1].mxu0 }
 0x2b1   : > { %v585_v38 = vpop.f32.mrb[2].mxu0 }
 0x2b2   : > { %v2820_v39 = vpack.c.bf16 %v585_v38, %v582_v36  ;;  %v2003_v40 = vpop.f32.mrb[3].mxu0 }
 0x2b4   : > { %593 = vrot.lane.b32.xlu1 %v2820_v39, %s2485_s9  ;;  %591 = vrot.lane.b32.xlu0 %v2820_v39, %s2486_s30 }
 0x2b8   : > { %595 = vrot.lane.b32.xlu1 %v2820_v39, %s2487_s18 }
 0x2bc   : > { %597 = vrot.lane.b32.xlu1 %v2820_v39, %s2488_s0 }
 0x326   : > { %v2827_v41 = vpop.permute.xlu1 %593  ;;  %v2829_v42 = vpop.permute.xlu0 %591 }
 0x327   : > { %694 = vrot.lane.b32.xlu1 %v2827_v41, %s2488_s0  ;;  %646 = vrot.lane.b32.xlu0 %v2829_v42, %s2488_s0 }
 0x32a   : > { %v2835_v43 = vpop.permute.xlu1 %595 }
 0x32b   : > { %742 = vrot.lane.b32.xlu0 %v2835_v43, %s2488_s0 }
 0x32e   : > { %v598_v44 = vpop.permute.xlu1 %597 }
 0x32f   : > { %v604_v45 = vsel %vm599_vm3, %v598_v44, 0 }
 0x330   : > { %2005 = vmatpush3.bf16.xpose.msra.mxu1 %v604_v45 }
 0x331   : > { %2016 = vmatprep.subr.bf16.mxu1 %v2483_v17 }
 0x337   : > { %2007 = vmatmul.mubr.msk.bf16.vlgmr.msra.gmra.mrb[0].mxu1 %vm599_vm3, %v2820_v39 }
 0x338   : > { %2018 = vmatprep.mubr.msk.bf16.mxu1 %vm2484_vm2, %v2483_v17 }
 0x399   : > { %v695_v46 = vpop.permute.xlu1 %694  ;;  %v647_v47 = vpop.permute.xlu0 %646 }
 0x39a   : > { %v700_v48 = vsel %vm599_vm3, %v695_v46, 0  ;;  %v652_v49 = vsel %vm599_vm3, %v647_v47, 0 }
 0x39b   : > { %2011 = vmatpush3.bf16.xpose.msra.mxu0 %v652_v49  ;;  %2017 = vmatpush3.bf16.xpose.msra.mxu1 %v700_v48 }
 0x39c   : > { %2022 = vmatprep.subr.bf16.mxu0 %v2483_v17  ;;  %2028 = vmatprep.subr.bf16.mxu1 %v2483_v17 }
 0x39d   : > { %v743_v50 = vpop.permute.xlu0 %742 }
 0x39e   : > { %v748_v51 = vsel %vm599_vm3, %v743_v50, 0 }
 0x3a2   : > { %2013 = vmatmul.mubr.msk.bf16.vlgmr.msra.gmra.mrb[4].mxu0 %vm599_vm3, %v2829_v42  ;;  %2019 = vmatmul.mubr.msk.bf16.vlgmr.msra.gmra.mrb[4].mxu1 %vm599_vm3, %v2827_v41 }
 0x3a3   : > { %2023 = vmatpush3.bf16.xpose.msra.mxu0 %v748_v51  ;;  %2024 = vmatprep.mubr.msk.bf16.mxu0 %vm2484_vm2, %v2483_v17 }
 0x3a4   : > { %2034 = vmatprep.subr.bf16.mxu0 %v2483_v17  ;;  %2030 = vmatprep.mubr.msk.bf16.mxu1 %vm2484_vm2, %v2483_v17 }
 0x3aa   : > { %2025 = vmatmul.mubr.msk.bf16.vlgmr.msra.gmra.mrb[8].mxu0 %vm599_vm3, %v2835_v43 }
 0x3ab   : > { %2036 = vmatprep.mubr.msk.bf16.mxu0 %vm2484_vm2, %v2483_v17 }
 0x40a   : > { %v640_v52 = vpop.f32.mrb[0].mxu1 }
 0x40b   : > { %v2008_v53 = vpop.f32.mrb[1].mxu1  ;;  %v791_v57 = vmul.f32 %v2863_v56, %v640_v52 }
 0x40c   : > { %v643_v54 = vpop.f32.mrb[2].mxu1 }
 0x40d   : > { %v2009_v55 = vpop.f32.mrb[3].mxu1  ;;  %v795_v4 = vsel %vm599_vm3, %v791_v57, 0.0 }
 0x475   : > { %v688_v58 = vpop.f32.mrb[4].mxu0  ;;  %v736_v59 = vpop.f32.mrb[4].mxu1 }
 0x476   : > { %v792_v60 = vmul.f32 %v2863_v56, %v688_v58  ;;  %v793_v61 = vmul.f32 %v2863_v56, %v736_v59  ;;  %v2014_v62 = vpop.f32.mrb[5].mxu0  ;;  %v2020_v63 = vpop.f32.mrb[5].mxu1 }
 0x477   : > { %v691_v0 = vpop.f32.mrb[6].mxu0  ;;  %v739_v1 = vpop.f32.mrb[6].mxu1 }
 0x478   : > { %v796_v5 = vsel %vm599_vm3, %v792_v60, 0.0  ;;  %v2015_v6 = vpop.f32.mrb[7].mxu0  ;;  %v2021_v7 = vpop.f32.mrb[7].mxu1  ;;  %v798_v9 = vsel %vm599_vm3, %v793_v61, 0.0 }
 0x479   : > { %v797_v8 = vadd.f32 %v796_v5, %v795_v4 }
 0x47b   : > { %v799_v10 = vadd.f32 %v798_v9, %v797_v8 }
 0x47d   : > { %v784_v11 = vpop.f32.mrb[8].mxu0 }
 0x47e   : > { %v794_v12 = vmul.f32 %v2863_v56, %v784_v11  ;;  %v2026_v13 = vpop.f32.mrb[9].mxu0 }
 0x47f   : > { %v787_v14 = vpop.f32.mrb[10].mxu0 }
 0x480   : > { %v800_v15 = vsel %vm599_vm3, %v794_v12, 0.0  ;;  %v2027_v16 = vpop.f32.mrb[11].mxu0 }
 0x481   : > { %v801_v18 = vadd.f32 %v800_v15, %v799_v10 }
 0x483   : > { %v803_v19 = vmul.f32 0.25, %v801_v18 }
 0x485   : > { %v804_v20 = vsub.f32 %v791_v57, %v803_v19  ;;  %v806_v21 = vsub.f32 %v793_v61, %v803_v19  ;;  %v807_v22 = vsub.f32 %v794_v12, %v803_v19  ;;  %v805_v23 = vsub.f32 %v792_v60, %v803_v19 }
 0x487   : > { %v810_v24 = vmul.f32 %v806_v21, %v806_v21  ;;  %v808_v25 = vmul.f32 %v804_v20, %v804_v20  ;;  %v809_v26 = vmul.f32 %v805_v23, %v805_v23  ;;  %v811_v27 = vmul.f32 %v807_v22, %v807_v22 }
 0x489   : > { %v812_v28 = vsel %vm599_vm3, %v808_v25, 0.0  ;;  %v813_v29 = vsel %vm599_vm3, %v809_v26, 0.0  ;;  %v815_v31 = vsel %vm599_vm3, %v810_v24, 0.0  ;;  %v817_v33 = vsel %vm599_vm3, %v811_v27, 0.0 }
 0x48a   : > { %v814_v30 = vadd.f32 %v813_v29, %v812_v28 }
 0x48c   : > { %v816_v32 = vadd.f32 %v815_v31, %v814_v30 }
 0x48e   : > { %v818_v34 = vadd.f32 %v817_v33, %v816_v32  ;;  %v2221_v33 = vld [vmem:[%s2780_s27] sm:$0xff]  }
 0x490   : > { %v819_v35 = vmul.f32 0.33333334, %v818_v34  ;;  %v2222_v34 = vld [vmem:[%s2780_s27 + $0x8] sm:$0xff]  }
 0x492   : > { %2229 = vrsqrt.f32 %v819_v35 }
 0x49c   : > { %v2230_v36 = vpop.eup %2229 }
 0x49d   : > { %v822_v37 = vmul.f32 %v2230_v36, %v805_v23  ;;  %v821_v38 = vmul.f32 %v2230_v36, %v804_v20  ;;  %v823_v40 = vmul.f32 %v2230_v36, %v806_v21  ;;  %v824_v44 = vmul.f32 %v2230_v36, %v807_v22 }
 0x49f   : > { %v828_v45 = vsel %vm599_vm3, %v822_v37, -inf  ;;  %v825_v46 = vsel %vm599_vm3, %v821_v38, -inf  ;;  %v831_v47 = vsel %vm599_vm3, %v823_v40, -inf  ;;  %v834_v48 = vsel %vm599_vm3, %v824_v44, -inf }
 0x4a0   : > { %829 = vmax.xlane.f32.xlu0 %v828_v45  ;;  %826 = vmax.xlane.f32.xlu1 %v825_v46 }
 0x4a4   : > { %832 = vmax.xlane.f32.xlu0 %v831_v47 }
 0x4a8   : > { %835 = vmax.xlane.f32.xlu0 %v834_v48 }
 0x4b1   : > { %873 = vrot.lane.b32.xlu1 %v2820_v39, %s2489_s26 }
 0x52d   : > { %v830_v49 = vpop.xlane.xlu0 %829  ;;  %v827_v50 = vpop.xlane.xlu1 %826 }
 0x52e   : > { %v838_v51 = vsub.f32 %v822_v37, %v830_v49  ;;  %v837_v52 = vsub.f32 %v821_v38, %v827_v50 }
 0x530   : > { %v843_v53 = vmul.f32 1.442695, %v838_v51  ;;  %v841_v54 = vmul.f32 1.442695, %v837_v52 }
 0x531   : > { %v833_v55 = vpop.xlane.xlu0 %832  ;;  %v874_v57 = vpop.permute.xlu1 %873 }
 0x532   : > { %2231 = vpow2.f32 %v843_v53  ;;  %v839_v58 = vsub.f32 %v823_v40, %v833_v55  ;;  %v880_v59 = vsel %vm878_vm4, %v874_v57, 0  ;;  %v2921_v55 = vrot.slane %v2820_v39, 4 }
 0x533   : > { %2233 = vpow2.f32 %v841_v54  ;;  %2029 = vmatpush3.bf16.msra.mxu1 %v880_v59  ;;  %v2924_v57 = vrot.slane %v2829_v42, 4  ;;  %v2934_v59 = vrot.slane %v2835_v43, 4 }
 0x534   : > { %v845_v60 = vmul.f32 1.442695, %v839_v58  ;;  %2040 = vmatprep.subr.bf16.mxu1 %v2483_v17  ;;  %v2931_v58 = vrot.slane %v2827_v41, 4 }
 0x535   : > { %v836_v61 = vpop.xlane.xlu0 %835 }
 0x536   : > { %2235 = vpow2.f32 %v845_v60  ;;  %v840_v62 = vsub.f32 %v824_v44, %v836_v61 }
 0x538   : > { %v847_v63 = vmul.f32 1.442695, %v840_v62 }
 0x53a   : > { %2237 = vpow2.f32 %v847_v63 }
 0x53c   : > { %v2232_v0 = vpop.eup %2231 }
 0x53d   : > { %v2234_v1 = vpop.eup %2233  ;;  %v852_v4 = vsel %vm599_vm3, %v2232_v0, 0.0 }
 0x53e   : > { %853 = vadd.xlane.f32.xlu0 %v852_v4  ;;  %v849_v5 = vsel %vm599_vm3, %v2234_v1, 0.0 }
 0x53f   : > { %850 = vadd.xlane.f32.xlu1 %v849_v5 }
 0x540   : > { %v2236_v6 = vpop.eup %2235 }
 0x541   : > { %v855_v7 = vsel %vm599_vm3, %v2236_v6, 0.0 }
 0x543   : > { %856 = vadd.xlane.f32.xlu1 %v855_v7 }
 0x544   : > { %v2238_v8 = vpop.eup %2237 }
 0x545   : > { %v858_v9 = vsel %vm599_vm3, %v2238_v8, 0.0 }
 0x546   : > { %859 = vadd.xlane.f32.xlu0 %v858_v9  ;;  %v2975_v9 = vld [vmem:[%s468_s28] ss:$0 sm:$0xff] }
 0x554   : > { %970 = vrot.lane.b32.xlu1 %v2827_v41, %s2489_s26 }
 0x558   : > { %1018 = vrot.lane.b32.xlu1 %v2835_v43, %s2489_s26 }
 0x55c   : > { %922 = vrot.lane.b32.xlu0 %v2829_v42, %s2489_s26 }
 0x5cb   : > { %v854_v10 = vpop.xlane.xlu0 %853 }
 0x5cc   : > { %2239 = vrcp.f32 %v854_v10  ;;  %v851_v11 = vpop.xlane.xlu1 %850 }
 0x5cd   : > { %2241 = vrcp.f32 %v851_v11 }
 0x5d0   : > { %v857_v12 = vpop.xlane.xlu1 %856 }
 0x5d1   : > { %2243 = vrcp.f32 %v857_v12 }
 0x5d3   : > { %v860_v13 = vpop.xlane.xlu0 %859 }
 0x5d4   : > { %2245 = vrcp.f32 %v860_v13  ;;  %v971_v14 = vpop.permute.xlu1 %970 }
 0x5d5   : > { %v976_v26 = vsel %vm878_vm4, %v971_v14, 0 }
 0x5d6   : > { %v2240_v15 = vpop.eup %2239 }
 0x5d7   : > { %v2242_v16 = vpop.eup %2241  ;;  %v866_v18 = vmul.f32 %v2240_v15, %v2232_v0  ;;  %v923_v19 = vpop.permute.xlu0 %922 }
 0x5d8   : > { %v865_v20 = vmul.f32 %v2242_v16, %v2234_v1  ;;  %v928_v21 = vsel %vm878_vm4, %v923_v19, 0  ;;  %v1019_v22 = vpop.permute.xlu1 %1018 }
 0x5d9   : > { %2035 = vmatpush3.bf16.msra.mxu0 %v928_v21  ;;  %v870_v23 = vpack.c.bf16 %v866_v18, %v866_v18  ;;  %v1024_v27 = vsel %vm878_vm4, %v1019_v22, 0 }
 0x5da   : > { %v869_v24 = vpack.c.bf16 %v865_v20, %v865_v20  ;;  %2046 = vmatprep.subr.bf16.mxu0 %v2483_v17 }
 0x5db   : > { %v2244_v25 = vpop.eup %2243 }
 0x5dc   : > { %2031 = vmatmul.mubr.msk.bf16.vlgmr.msra.gmra.mrb[8].mxu1 %vm599_vm3, %v869_v24  ;;  %2037 = vmatmul.mubr.msk.bf16.vlgmr.msra.gmra.mrb[12].mxu0 %vm599_vm3, %v870_v23  ;;  %v867_v29 = vmul.f32 %v2244_v25, %v2236_v6 }
 0x5dd   : > { %2041 = vmatpush3.bf16.msra.mxu1 %v976_v26  ;;  %2047 = vmatpush3.bf16.msra.mxu0 %v1024_v27 }
 0x5de   : > { %v2246_v28 = vpop.eup %2245  ;;  %2042 = vmatprep.mubr.msk.bf16.mxu1 %vm2484_vm2, %v2483_v17  ;;  %2048 = vmatprep.mubr.msk.bf16.mxu0 %vm2484_vm2, %v2483_v17  ;;  %v871_v32 = vpack.c.bf16 %v867_v29, %v867_v29 }
 0x5df   : > { %v868_v30 = vmul.f32 %v2246_v28, %v2238_v8  ;;  %2052 = vmatprep.subr.bf16.mxu1 %v2483_v17  ;;  %2060 = vmatprep.subr.bf16.mxu0 %v2483_v17 }
 0x5e1   : > { %v872_v31 = vpack.c.bf16 %v868_v30, %v868_v30 }
 0x5e4   : > { %2043 = vmatmul.mubr.msk.bf16.vlgmr.msra.gmra.mrb[12].mxu1 %vm599_vm3, %v871_v32  ;;  %2049 = vmatmul.mubr.msk.bf16.vlgmr.msra.gmra.mrb[16].mxu0 %vm599_vm3, %v872_v31 }
 0x5e5   : > { %2056 = vmatprep.mubr.msk.bf16.mxu1 %vm2484_vm2, %v2483_v17  ;;  %2062 = vmatprep.mubr.msk.bf16.mxu0 %vm2484_vm2, %v2483_v17 }
 0x5e6   : > { %2053 = vmatpush3.bf16.msra.mxu1 %v2221_v33 }
 0x5e7   : > { %2054 = vmatprep.subr.bf16.mxu1 %v2483_v17 }
 0x5ea   : > { %2055 = vmatpush3.bf16.msra.mxu1 %v2222_v34 }
 0x5eb   : > { %2066 = vmatprep.subr.bf16.mxu1 %v2483_v17 }
 0x6af   : > { %v916_v35 = vpop.f32.mrb[8].mxu1  ;;  %v964_v36 = vpop.f32.mrb[12].mxu0 }
 0x6b0   : > { %v2032_v37 = vpop.f32.mrb[9].mxu1  ;;  %1067 = vrot.lane.b32.xlu1 %v964_v36, %s2490_s24  ;;  %v2038_v38 = vpop.f32.mrb[13].mxu0 }
 0x6b1   : > { %v919_v40 = vpop.f32.mrb[10].mxu1  ;;  %v967_v44 = vpop.f32.mrb[14].mxu0 }
 0x6b2   : > { %v2033_v45 = vpop.f32.mrb[11].mxu1  ;;  %v2039_v46 = vpop.f32.mrb[15].mxu0 }
 0x6b7   : > { %v1012_v47 = vpop.f32.mrb[12].mxu1  ;;  %v1060_v48 = vpop.f32.mrb[16].mxu0 }
 0x6b8   : > { %1071 = vrot.lane.b32.xlu0 %v1012_v47, %s2491_s22  ;;  %v2044_v49 = vpop.f32.mrb[13].mxu1  ;;  %1075 = vrot.lane.b32.xlu1 %v1060_v48, %s2492_s21  ;;  %v2050_v50 = vpop.f32.mrb[17].mxu0 }
 0x6b9   : > { %v1015_v51 = vpop.f32.mrb[14].mxu1  ;;  %v1063_v52 = vpop.f32.mrb[18].mxu0 }
 0x6ba   : > { %v2045_v53 = vpop.f32.mrb[15].mxu1  ;;  %v2051_v54 = vpop.f32.mrb[19].mxu0 }
 0x6bc   : > { %1153 = vrot.lane.b32.xlu0 %v2921_v55, %s2488_s0  ;;  %1202 = vrot.lane.b32.xlu1 %v2924_v57, %s2488_s0 }
 0x6c0   : > { %1251 = vrot.lane.b32.xlu0 %v2931_v58, %s2488_s0  ;;  %1300 = vrot.lane.b32.xlu1 %v2934_v59, %s2488_s0 }
 0x722   : > { %v1068_v39 = vpop.permute.xlu1 %1067 }
 0x723   : > { %v1078_v42 = vsel %vm599_vm3, %v916_v35, %v1068_v39 }
 0x72a   : > { %v1072_v60 = vpop.permute.xlu0 %1071  ;;  %v1076_v61 = vpop.permute.xlu1 %1075 }
 0x72b   : > { %v1080_v62 = vsel %vm1079_vm5, %v1078_v42, %v1072_v60 }
 0x72c   : > { %v1082_v41 = vsel %vm1081_vm6, %v1080_v62, %v1076_v61 }
 0x72d   : > { %v1083_v63 = vpack.c.bf16 %v1082_v41, %v1082_v41 }
 0x72e   : > { %v1154_v43 = vpop.permute.xlu0 %1153  ;;  %v1203_v0 = vpop.permute.xlu1 %1202 }
 0x72f   : > { %v1159_v1 = vsel %vm599_vm3, %v1154_v43, 0  ;;  %2057 = vmatmul.mubr.msk.bf16.vlgmr.msra.gmra.mrb[16].mxu1 %vm484_vm1, %v1083_v63  ;;  %v1208_v4 = vsel %vm599_vm3, %v1203_v0, 0 }
 0x730   : > { %2061 = vmatpush3.bf16.xpose.msra.mxu0 %v1159_v1  ;;  %2067 = vmatpush3.bf16.xpose.msra.mxu1 %v1208_v4 }
 0x731   : > { %2068 = vmatprep.mubr.msk.bf16.mxu1 %vm2484_vm2, %v2483_v17  ;;  %2072 = vmatprep.subr.bf16.mxu0 %v2483_v17 }
 0x732   : > { %2078 = vmatprep.subr.bf16.mxu1 %v2483_v17  ;;  %v1252_v5 = vpop.permute.xlu0 %1251  ;;  %v1301_v6 = vpop.permute.xlu1 %1300 }
 0x733   : > { %v1257_v7 = vsel %vm599_vm3, %v1252_v5, 0  ;;  %v1306_v8 = vsel %vm599_vm3, %v1301_v6, 0 }
 0x737   : > { %2063 = vmatmul.mubr.msk.bf16.vlgmr.msra.gmra.mrb[20].mxu0 %vm599_vm3, %v2921_v55  ;;  %2069 = vmatmul.mubr.msk.bf16.vlgmr.msra.gmra.mrb[20].mxu1 %vm599_vm3, %v2924_v57 }
 0x738   : > { %2073 = vmatpush3.bf16.xpose.msra.mxu0 %v1257_v7  ;;  %2079 = vmatpush3.bf16.xpose.msra.mxu1 %v1306_v8 }
 0x739   : > { %2074 = vmatprep.mubr.msk.bf16.mxu0 %vm2484_vm2, %v2483_v17  ;;  %2080 = vmatprep.mubr.msk.bf16.mxu1 %vm2484_vm2, %v2483_v17 }
 0x73a   : > { %2090 = vmatprep.subr.bf16.mxu1 %v2483_v17  ;;  %2084 = vmatprep.subr.bf16.mxu0 %v2483_v17 }
 0x73f   : > { %2075 = vmatmul.mubr.msk.bf16.vlgmr.msra.gmra.mrb[24].mxu0 %vm599_vm3, %v2931_v58  ;;  %2081 = vmatmul.mubr.msk.bf16.vlgmr.msra.gmra.mrb[24].mxu1 %vm599_vm3, %v2934_v59 }
 0x740   : > { %2086 = vmatprep.mubr.msk.bf16.mxu0 %vm2484_vm2, %v2483_v17  ;;  %2092 = vmatprep.mubr.msk.bf16.mxu1 %vm2484_vm2, %v2483_v17 }
 0x802   : > { %v1144_v10 = vpop.f32.mrb[16].mxu1 }
 0x803   : > { %v1145_v11 = vadd.f32 %v2975_v9, %v1144_v10  ;;  %v2058_v12 = vpop.f32.mrb[17].mxu1 }
 0x804   : > { %v1147_v13 = vpop.f32.mrb[18].mxu1 }
 0x805   : > { %v1150_v14 = vadd.f32 %v1145_v11, %v2783_v2  ;;  %v2059_v15 = vpop.f32.mrb[19].mxu1 }
 0x807   : > { %1151 = vst.msk [vmem:[#allocation2] sm:$0xff] %vm484_vm1, %v1150_v14 }
 0x80a   : > { %v1195_v16 = vpop.f32.mrb[20].mxu0  ;;  %v1244_v18 = vpop.f32.mrb[20].mxu1 }
 0x80b   : > { %v1349_v19 = vmul.f32 %v1195_v16, %v2863_v56  ;;  %v2064_v20 = vpop.f32.mrb[21].mxu0  ;;  %v1350_v21 = vmul.f32 %v1244_v18, %v2863_v56  ;;  %v2070_v22 = vpop.f32.mrb[21].mxu1 }
 0x80c   : > { %v1198_v23 = vpop.f32.mrb[22].mxu0  ;;  %v1247_v24 = vpop.f32.mrb[22].mxu1 }
 0x80d   : > { %v1353_v25 = vsel %vm599_vm3, %v1349_v19, 0.0  ;;  %v1354_v26 = vsel %vm599_vm3, %v1350_v21, 0.0  ;;  %v2065_v27 = vpop.f32.mrb[23].mxu0  ;;  %v2071_v28 = vpop.f32.mrb[23].mxu1 }
 0x80e   : > { %v1355_v2 = vadd.f32 %v1354_v26, %v1353_v25 }
 0x812   : > { %v1293_v29 = vpop.f32.mrb[24].mxu0  ;;  %v1342_v30 = vpop.f32.mrb[24].mxu1 }
 0x813   : > { %v1351_v31 = vmul.f32 %v1293_v29, %v2863_v56  ;;  %v2076_v32 = vpop.f32.mrb[25].mxu0  ;;  %v1352_v33 = vmul.f32 %v1342_v30, %v2863_v56  ;;  %v2082_v34 = vpop.f32.mrb[25].mxu1 }
 0x814   : > { %v1296_v35 = vpop.f32.mrb[26].mxu0  ;;  %v1345_v36 = vpop.f32.mrb[26].mxu1 }
 0x815   : > { %v1356_v37 = vsel %vm599_vm3, %v1351_v31, 0.0  ;;  %v1358_v38 = vsel %vm599_vm3, %v1352_v33, 0.0  ;;  %v2077_v40 = vpop.f32.mrb[27].mxu0  ;;  %v2083_v44 = vpop.f32.mrb[27].mxu1 }
 0x816   : > { %v1357_v45 = vadd.f32 %v1356_v37, %v1355_v2 }
 0x818   : > { %v1359_v46 = vadd.f32 %v1358_v38, %v1357_v45 }
 0x81a   : > { %v1360_v47 = vmul.f32 0.25, %v1359_v46 }
 0x81c   : > { %v1361_v48 = vsub.f32 %v1349_v19, %v1360_v47  ;;  %v1363_v49 = vsub.f32 %v1351_v31, %v1360_v47  ;;  %v1364_v50 = vsub.f32 %v1352_v33, %v1360_v47  ;;  %v1362_v51 = vsub.f32 %v1350_v21, %v1360_v47 }
 0x81e   : > { %v1367_v52 = vmul.f32 %v1363_v49, %v1363_v49  ;;  %v1365_v53 = vmul.f32 %v1361_v48, %v1361_v48  ;;  %v1366_v54 = vmul.f32 %v1362_v51, %v1362_v51  ;;  %v1368_v56 = vmul.f32 %v1364_v50, %v1364_v50 }
 0x820   : > { %v1369_v39 = vsel %vm599_vm3, %v1365_v53, 0.0  ;;  %v1370_v42 = vsel %vm599_vm3, %v1366_v54, 0.0  ;;  %v1372_v61 = vsel %vm599_vm3, %v1367_v52, 0.0  ;;  %v1374_v41 = vsel %vm599_vm3, %v1368_v56, 0.0 }
 0x821   : > { %v1371_v60 = vadd.f32 %v1370_v42, %v1369_v39  ;;  %v2223_v39 = vld [vmem:[%s2780_s27] sm:$0xff]  }
 0x823   : > { %v1373_v62 = vadd.f32 %v1372_v61, %v1371_v60 }
 0x825   : > { %v1375_v63 = vadd.f32 %v1374_v41, %v1373_v62 }
 0x827   : > { %v1376_v43 = vmul.f32 0.33333334, %v1375_v63 }
 0x829   : > { %2247 = vrsqrt.f32 %v1376_v43 }
 0x833   : > { %v2248_v0 = vpop.eup %2247 }
 0x834   : > { %v1379_v1 = vmul.f32 %v2248_v0, %v1362_v51  ;;  %v1378_v4 = vmul.f32 %v2248_v0, %v1361_v48  ;;  %v1380_v5 = vmul.f32 %v2248_v0, %v1363_v49  ;;  %v1381_v6 = vmul.f32 %v2248_v0, %v1364_v50 }
 0x836   : > { %v1385_v7 = vsel %vm599_vm3, %v1379_v1, -inf  ;;  %v1382_v8 = vsel %vm599_vm3, %v1378_v4, -inf  ;;  %v1388_v10 = vsel %vm599_vm3, %v1380_v5, -inf  ;;  %v1391_v11 = vsel %vm599_vm3, %v1381_v6, -inf }
 0x837   : > { %1386 = vmax.xlane.f32.xlu1 %v1385_v7  ;;  %1383 = vmax.xlane.f32.xlu0 %v1382_v8  ;;  %v2224_v7 = vld [vmem:[%s2780_s27 + $0x8] sm:$0xff]  }
 0x83b   : > { %1389 = vmax.xlane.f32.xlu0 %v1388_v10 }
 0x83f   : > { %1392 = vmax.xlane.f32.xlu0 %v1391_v11 }
 0x8c4   : > { %v1387_v12 = vpop.xlane.xlu1 %1386  ;;  %v1384_v13 = vpop.xlane.xlu0 %1383 }
 0x8c5   : > { %v1395_v14 = vsub.f32 %v1379_v1, %v1387_v12  ;;  %v1394_v15 = vsub.f32 %v1378_v4, %v1384_v13 }
 0x8c7   : > { %v1400_v16 = vmul.f32 1.442695, %v1395_v14  ;;  %v1398_v18 = vmul.f32 1.442695, %v1394_v15 }
 0x8c8   : > { %v1390_v19 = vpop.xlane.xlu0 %1389 }
 0x8c9   : > { %2249 = vpow2.f32 %v1400_v16  ;;  %v1396_v20 = vsub.f32 %v1380_v5, %v1390_v19 }
 0x8ca   : > { %2251 = vpow2.f32 %v1398_v18 }
 0x8cb   : > { %v1402_v21 = vmul.f32 1.442695, %v1396_v20 }
 0x8cc   : > { %v1393_v28 = vpop.xlane.xlu0 %1392 }
 0x8cd   : > { %2253 = vpow2.f32 %v1402_v21  ;;  %v1397_v2 = vsub.f32 %v1381_v6, %v1393_v28 }
 0x8cf   : > { %v1404_v29 = vmul.f32 1.442695, %v1397_v2 }
 0x8d1   : > { %2255 = vpow2.f32 %v1404_v29 }
 0x8d3   : > { %v2250_v22 = vpop.eup %2249 }
 0x8d4   : > { %v2252_v23 = vpop.eup %2251  ;;  %v1409_v24 = vsel %vm599_vm3, %v2250_v22, 0.0 }
 0x8d5   : > { %1410 = vadd.xlane.f32.xlu1 %v1409_v24  ;;  %v1406_v25 = vsel %vm599_vm3, %v2252_v23, 0.0 }
 0x8d6   : > { %1407 = vadd.xlane.f32.xlu0 %v1406_v25 }
 0x8d7   : > { %v2254_v26 = vpop.eup %2253 }
 0x8d8   : > { %v1412_v27 = vsel %vm599_vm3, %v2254_v26, 0.0 }
 0x8da   : > { %1413 = vadd.xlane.f32.xlu0 %v1412_v27 }
 0x8db   : > { %v2256_v30 = vpop.eup %2255 }
 0x8dc   : > { %v1415_v31 = vsel %vm599_vm3, %v2256_v30, 0.0 }
 0x8e6   : > { %1478 = vrot.lane.b32.xlu1 %v2924_v57, %s2489_s26 }
 0x8ea   : > { %1526 = vrot.lane.b32.xlu1 %v2931_v58, %s2489_s26 }
 0x8f0   : > { %1430 = vrot.lane.b32.xlu0 %v2921_v55, %s2489_s26 }
 0x90e   : > { %1416 = vadd.xlane.f32.xlu1 %v1415_v31 }
 0x91f   : > { %1574 = vrot.lane.b32.xlu1 %v2934_v59, %s2489_s26 }
 0x962   : > { %v1411_v32 = vpop.xlane.xlu1 %1410 }
 0x963   : > { %2257 = vrcp.f32 %v1411_v32  ;;  %v1408_v57 = vpop.xlane.xlu0 %1407 }
 0x964   : > { %2259 = vrcp.f32 %v1408_v57 }
 0x966   : > { %v1479_v33 = vpop.permute.xlu1 %1478 }
 0x967   : > { %v1484_v58 = vsel %vm878_vm4, %v1479_v33, 0  ;;  %v1414_v34 = vpop.xlane.xlu0 %1413 }
 0x968   : > { %2261 = vrcp.f32 %v1414_v34  ;;  %2091 = vmatpush3.bf16.msra.mxu1 %v1484_v58 }
 0x969   : > { %2102 = vmatprep.subr.bf16.mxu1 %v2483_v17 }
 0x96a   : > { %v1527_v40 = vpop.permute.xlu1 %1526 }
 0x96b   : > { %v1431_v55 = vpop.permute.xlu0 %1430  ;;  %v1532_v47 = vsel %vm878_vm4, %v1527_v40, 0 }
 0x96c   : > { %v1436_v35 = vsel %vm878_vm4, %v1431_v55, 0 }
 0x96d   : > { %v2258_v36 = vpop.eup %2257  ;;  %2085 = vmatpush3.bf16.msra.mxu0 %v1436_v35 }
 0x96e   : > { %v2260_v37 = vpop.eup %2259  ;;  %v1423_v38 = vmul.f32 %v2258_v36, %v2250_v22  ;;  %2096 = vmatprep.subr.bf16.mxu0 %v2483_v17 }
 0x96f   : > { %v1422_v59 = vmul.f32 %v2260_v37, %v2252_v23 }
 0x970   : > { %v1427_v44 = vpack.c.bf16 %v1423_v38, %v1423_v38 }
 0x971   : > { %v1426_v45 = vpack.c.bf16 %v1422_v59, %v1422_v59 }
 0x972   : > { %v2262_v46 = vpop.eup %2261  ;;  %2093 = vmatmul.mubr.msk.bf16.vlgmr.msra.gmra.mrb[28].mxu1 %vm599_vm3, %v1427_v44  ;;  %v1947_v44 = vld [vmem:[%s3100_s7] ss:$0 sm:$0xff] (!%p1946_p0) }
 0x973   : > { %2087 = vmatmul.mubr.msk.bf16.vlgmr.msra.gmra.mrb[28].mxu0 %vm599_vm3, %v1426_v45  ;;  %2104 = vmatprep.mubr.msk.bf16.mxu1 %vm2484_vm2, %v2483_v17  ;;  %v1424_v48 = vmul.f32 %v2262_v46, %v2254_v26  ;;  %v1711_v26 = vld [vmem:[#allocation2] sm:$0xff] (!%p1946_p0) }
 0x974   : > { %2097 = vmatpush3.bf16.msra.mxu0 %v1532_v47  ;;  %2098 = vmatprep.mubr.msk.bf16.mxu0 %vm2484_vm2, %v2483_v17  ;;  %v1715_v28 = vsel (!%p1946_p0), %vm484_vm1, %v1711_v26, 0.0  ;;  %v1948_v46 = vld [vmem:[%s3101_s8] ss:$0 sm:$0xff] (!%p1946_p0) }
 0x975   : > { %2108 = vmatprep.subr.bf16.mxu0 %v2483_v17  ;;  %v1428_v49 = vpack.c.bf16 %v1424_v48, %v1424_v48 }
 0x97b   : > { %2099 = vmatmul.mubr.msk.bf16.vlgmr.msra.gmra.mrb[32].mxu0 %vm599_vm3, %v1428_v49 }
 0x97c   : > { %2112 = vmatprep.mubr.msk.bf16.mxu0 %vm2484_vm2, %v2483_v17  ;;  %2109 = vmatpush3.bf16.msra.mxu0 %v2223_v39 }
 0x97d   : > { %2110 = vmatprep.subr.bf16.mxu0 %v2483_v17 }
 0x980   : > { %2111 = vmatpush3.bf16.msra.mxu0 %v2224_v7 }
 0x99b   : > { %v1417_v50 = vpop.xlane.xlu1 %1416 }
 0x99c   : > { %2263 = vrcp.f32 %v1417_v50 }
 0x99f   : > { %v1575_v51 = vpop.permute.xlu1 %1574 }
 0x9a0   : > { %v1580_v52 = vsel %vm878_vm4, %v1575_v51, 0 }
 0x9a1   : > { %2103 = vmatpush3.bf16.msra.mxu1 %v1580_v52 }
 0x9a6   : > { %v2264_v53 = vpop.eup %2263 }
 0x9a7   : > { %v1425_v54 = vmul.f32 %v2264_v53, %v2256_v30 }
 0x9a9   : > { %v1429_v56 = vpack.c.bf16 %v1425_v54, %v1425_v54 }
 0x9ab   : > { %2105 = vmatmul.mubr.msk.bf16.vlgmr.msra.gmra.mrb[32].mxu1 %vm599_vm3, %v1429_v56 }
 0xa45   : > { %v1520_v42 = vpop.f32.mrb[28].mxu1 }
 0xa46   : > { %v1472_v60 = vpop.f32.mrb[28].mxu0  ;;  %v2094_v61 = vpop.f32.mrb[29].mxu1  ;;  %1623 = vrot.lane.b32.xlu0 %v1520_v42, %s2490_s24 }
 0xa47   : > { %v2088_v62 = vpop.f32.mrb[29].mxu0  ;;  %v1523_v41 = vpop.f32.mrb[30].mxu1 }
 0xa48   : > { %v1475_v63 = vpop.f32.mrb[30].mxu0  ;;  %v2095_v43 = vpop.f32.mrb[31].mxu1 }
 0xa49   : > { %v2089_v0 = vpop.f32.mrb[31].mxu0 }
 0xa4e   : > { %v1568_v1 = vpop.f32.mrb[32].mxu0 }
 0xa4f   : > { %1627 = vrot.lane.b32.xlu1 %v1568_v1, %s2491_s22  ;;  %v2100_v4 = vpop.f32.mrb[33].mxu0 }
 0xa50   : > { %v1571_v5 = vpop.f32.mrb[34].mxu0 }
 0xa51   : > { %v2101_v6 = vpop.f32.mrb[35].mxu0 }
 0xa7e   : > { %v1616_v8 = vpop.f32.mrb[32].mxu1 }
 0xa7f   : > { %1631 = vrot.lane.b32.xlu0 %v1616_v8, %s2492_s21  ;;  %v2106_v17 = vpop.f32.mrb[33].mxu1 }
 0xa80   : > { %v1619_v10 = vpop.f32.mrb[34].mxu1 }
 0xa81   : > { %v2107_v11 = vpop.f32.mrb[35].mxu1 }
 0xa9e   : > { %1716 = vadd.xlane.f32.xlu0 (!%p1946_p0), %v1715_v28 }
 0xab8   : > { %v1624_v12 = vpop.permute.xlu0 %1623 }
 0xab9   : > { %v1634_v14 = vsel %vm599_vm3, %v1472_v60, %v1624_v12 }
 0xac1   : > { %v1628_v13 = vpop.permute.xlu1 %1627 }
 0xac2   : > { %v1635_v15 = vsel %vm1079_vm5, %v1634_v14, %v1628_v13 }
 0xaf1   : > { %v1632_v16 = vpop.permute.xlu0 %1631 }
 0xaf2   : > { %v1636_v18 = vsel %vm1081_vm6, %v1635_v15, %v1632_v16 }
 0xaf3   : > { %v1637_v19 = vpack.c.bf16 %v1636_v18, %v1636_v18 }
 0xaf5   : > { %2113 = vmatmul.mubr.msk.bf16.vlgmr.msra.gmra.mrb[36].mxu0 %vm484_vm1, %v1637_v19 }
 0xb2b   : > { %v1717_v29 = vpop.xlane.xlu0 (!%p1946_p0), %1716 }
 0xbc7   : > { %1710 = sbr.rel (%p1946_p0) target bundleno = 3343 (0xd0f), region = 80 }
 0xbc8   : > { %v1698_v20 = vpop.f32.mrb[36].mxu0 }
 0xbc9   : > { %v1699_v21 = vadd.f32 %v2975_v9, %v1698_v20  ;;  %v2114_v22 = vpop.f32.mrb[37].mxu0  ;;  %v1721_v9 = vmul.f32 (!%p1946_p0), 0.03125, %v1717_v29 }
 0xbca   : > { %v1701_v23 = vpop.f32.mrb[38].mxu0 }
 0xbcb   : > { %v1704_v24 = vadd.f32 %v1699_v21, %v2785_v3  ;;  %v2115_v25 = vpop.f32.mrb[39].mxu0  ;;  %v1723_v30 = vsub.f32 (!%p1946_p0), %v1711_v26, %v1721_v9 }
 0xbcd   : > { %1706 = vst.msk [vmem:[#allocation2 + $0x8] sm:$0xff] %vm484_vm1, %v1704_v24  ;;  %v1725_v3 = vmul.f32 (!%p1946_p0), %v1723_v30, %v1723_v30 }
 0xbcf   : > { %v1727_v33 = vsel %vm484_vm1, %v1725_v3, 0.0 }
 0xbd0   : > { %1728 = vadd.xlane.f32.xlu1 %v1727_v33 }
 0xbd4   : > { %v1712_v27 = vld [vmem:[#allocation2 + $0x8] sm:$0xff] }
 0xbd5   : > { %v1718_v2 = vsel %vm484_vm1, %v1712_v27, 0.0 }
 0xbd6   : > { %1719 = vadd.xlane.f32.xlu0 %v1718_v2 }
 0xc5d   : > { %v1729_v55 = vpop.xlane.xlu1 %1728 }
 0xc5e   : > { %v1733_v35 = vmul.f32 0.03125, %v1729_v55 }
 0xc60   : > { %v1735_v36 = vadd.f32 1e-05, %v1733_v35 }
 0xc62   : > { %2265 = vrsqrt.f32 %v1735_v36 }
 0xc63   : > { %v1720_v31 = vpop.xlane.xlu0 %1719 }
 0xc64   : > { %v1722_v32 = vmul.f32 0.03125, %v1720_v31 }
 0xc66   : > { %v1724_v57 = vsub.f32 %v1712_v27, %v1722_v32 }
 0xc68   : > { %v1726_v58 = vmul.f32 %v1724_v57, %v1724_v57 }
 0xc6a   : > { %v1730_v34 = vsel %vm484_vm1, %v1726_v58, 0.0 }
 0xc6b   : > { %1731 = vadd.xlane.f32.xlu1 %v1730_v34 }
 0xc6c   : > { %v2266_v40 = vpop.eup %2265 }
 0xc6d   : > { %v1739_v45 = vmul.f32 %v2266_v40, %v1723_v30 }
 0xc6f   : > { %v1747_v47 = vmul.f32 %v1947_v44, %v1739_v45 }
 0xc71   : > { %v1755_v49 = vadd.f32 %v1948_v46, %v1747_v47 }
 0xc73   : > { %1757 = vst.msk [vmem:[#allocation10] sm:$0xff] %vm484_vm1, %v1755_v49 }
 0xcf8   : > { %v1732_v37 = vpop.xlane.xlu1 %1731 }
 0xcf9   : > { %v1734_v38 = vmul.f32 0.03125, %v1732_v37 }
 0xcfb   : > { %v1736_v59 = vadd.f32 1e-05, %v1734_v38 }
 0xcfd   : > { %2267 = vrsqrt.f32 %v1736_v59 }
 0xd07   : > { %v2268_v48 = vpop.eup %2267 }
 0xd08   : > { %v1740_v50 = vmul.f32 %v2268_v48, %v1724_v57 }
 0xd0a   : > { %v1748_v51 = vmul.f32 %v1947_v44, %v1740_v50 }
 0xd0c   : > { %v1756_v52 = vadd.f32 %v1948_v46, %v1748_v51 }
 0xd0e   : > { %1758 = vst.msk [vmem:[#allocation10 + $0x8] sm:$0xff] %vm484_vm1, %v1756_v52 }
 0xd0f PF: > { %p2151_p12 = scmp.eq.s32.totalorder %s2574_s15, 1  ;;  %s2493_s28 = smov [#allocation10]  }
 0xd10   : > { %s1768_s27 = sshll.u32 %s2493_s28, 4  ;;  %s1769_s27 = int_to_ptr.vmem [resolvable:$true] %s1768_s27 }
 0xd11   : > { %s2385_s20 = scalar_lea.vmem %s1769_s27, 256  ;;  %p2392_p3 = scmp.lt.s32.totalorder %s1769_s27, %s1769_s27 }
 0xd12   : > { %p2386_p2 = scmp.ne.s32.totalorder %s1769_s27, %s2385_s20  ;;  %p2393_p11 = scmp.lt.s32.totalorder %s2385_s20, %s2385_s20 }
 0xd14   : > { %p2387_p9 = pnand %p2386_p2, %p2151_p12  ;;  %p2394_p6 = por %p2393_p11, %p2392_p3 }
 0xd16   : > { %p2388_p10 = pneg %p2387_p9 }
 0xd18   : > { %p2395_p8 = pnand %p2394_p6, %p2388_p10 }
 0xd1a   : > { %2398 = shalt.err (!%p2395_p8)
}
 0xd1b   : > { %s3142_s23 = sld [smem:[#allocation20_spill]] }
 0xd21   : > { %s2399_s9 = scalar_lea.hbm %s3142_s23, 256 }
 0xd22   : > { %p2400_p1 = scmp.ne.s32.totalorder %s3142_s23, %s2399_s9  ;;  %p2405_p5 = scmp.lt.u32.totalorder %s2399_s9, %s3142_s23 }
 0xd24   : > { %p2401_p4 = pnand %p2400_p1, %p2151_p12 }
 0xd26   : > { %p2402_p13 = pneg %p2401_p4 }
 0xd28   : > { %p2407_p7 = pnand %p2405_p5, %p2402_p13 }
 0xd2a   : > { %2410 = shalt.err (!%p2407_p7)
}
 0xd2b   : > { %s2494_s22 = smov 128  }
 0xd2c   : > { %2129 = dma.vmem_to_hbm [thread:$0]  (%p2151_p12), %s1769_s27, 256, %s3142_s23, [#allocation5], %s2494_s22, %s2494_s22, %s2490_s24  }
 0xd2d   : > { %2448 = dma.done.wait (%p2151_p12), [#allocation5], 256  }
 0xd2e   : > { %2450 = vsyncadd (%p2151_p12), [#allocation5], 4294967040 }
 0xd2f PF: > { %s22_s14 = sadd.s32 1, %s2473_s14   ;;  %s3143_s11 = sld [smem:[#allocation15_spill]] }
 0xd30   : > { %p19_p0 = scmp.ge.s32.totalorder %s22_s14, 4   ;;  %s3144_s12 = sld [smem:[#allocation17_spill]] }
 0xd31   : > { %s3145_s19 = sld [smem:[#allocation16_spill]]  ;;  %s3146_s30 = smov %s2457_s10 }
 0xd32   :  { %21 = sbr.rel (!%p19_p0) target bundleno = 9 (0x9), region = 131 }
 0xd35   : > { %s3147_s10 = smov %s3143_s11 }
 0xd36   : > { %s3148_s11 = smov %s3144_s12  ;;  %s3149_s12 = smov %s2469_s13 }
 0xd37   : > { %s3150_s13 = smov %s3145_s19 }
 0xd39   :  { %1784 = vsyncpa [#allocation4], 1 }
 0xd3a   :  { %1786 = vsyncpa [#allocation4 + $0x1], 1 }
 0xd3b   :  { %1787 = vsyncpa [#allocation7], 1 }
 0xd3c   :  { %1788 = vsyncpa [#allocation5], 1 }
 0xd3d   :  { %1790 = vsyncpa [#allocation5 + $0x1], 1 }

</bundles_post_ra>
